<compile_context>
chip_gen: v7x
topology: tpu7x:2x2x1
jax: 0.10.0
libtpu: 0.0.40
codegen_flags: <defaults>
</compile_context>

<pallas_src>
import functools

import jax
import jax.numpy as jnp
from jax.experimental import pallas as pl
from jax.experimental.pallas import tpu as pltpu


# Shapes fixed by the module: Linear(49, 3) => 7x7 spatial, Conv2d(1024, 512, 1) => channels.
S = 49           # 7 * 7 flattened spatial positions
S_PAD = 56       # spatial padded to a multiple of 8 sublanes
C_IN = 1024      # input channels
C_MID = 512      # channels after the first 1x1 conv
FCP = 128        # lane-padded width for the 3-wide FC output / weights
MAX_B_TILE = 8   # batch elements per grid step (8 * 56 = 448 MXU rows)


def _pick_b_tile(bs):
    """Batch elements per grid step: fill the MXU, but keep >= 2 grid steps whenever
    bs >= 2 so both v7x TensorCores get work (v5e/v6e have 1 TC; no harm there)."""
    if bs <= 1:
        return 1
    return min(MAX_B_TILE, pl.cdiv(bs, 2))


# ----------------------------------------------------------------------------
# Pallas kernel: conv1+BN+ReLU -> conv2+BN+ReLU -> Linear(49,3) -> L2 normalize
# One grid step == B_TILE batch elements.
# ----------------------------------------------------------------------------
def _coarse_decoder_kernel(x_ref, w1_ref, vec_ref, fc_ref, o_ref, *, b_tile):
    # x_ref: (b_tile * S_PAD, C_IN) bf16 -- channels on the 128-lane axis.
    x = x_ref[...]

    # conv1 (1x1, 1024->512) on the MXU, f32 accumulate.  BN1 scale is folded into w1
    # at init, so the epilogue is just bias add + ReLU (f32: v5e has no bf16 VPU).
    h = jnp.dot(x, w1_ref[...], preferred_element_type=jnp.float32)       # (M, C_MID)
    h = jnp.maximum(h + vec_ref[0:1, :], 0.0)

    # conv2 (1x1, 512->1) with BN2 scale folded into w2: lane reduce + bias + ReLU.
    # No lane-width-1 tensor ever leaves the kernel.
    d = jnp.sum(h * vec_ref[1:2, :], axis=-1, keepdims=True)              # (M, 1)
    d = jnp.maximum(d + vec_ref[2:3, 0:1], 0.0)

    # Linear(49, 3): per-batch spatial reduce against the lane-padded FC weight.
    # fc rows [S:S_PAD) and lanes [3:) are exactly zero, so neither the spatial padding
    # nor the lane padding perturbs the result.
    d3 = d.reshape(b_tile, S_PAD, 1)                                      # free reshape
    wfc = fc_ref[0:S_PAD, :]                                              # (S_PAD, FCP)
    o = jnp.sum(d3 * wfc[None, :, :], axis=1) + fc_ref[S_PAD:S_PAD + 1, :]  # (b_tile, FCP)

    # Row-wise L2 normalize; torch semantics: norms <= 0 replaced by 1.0.
    # rsqrt runs on the EUP slot (off the VPU critical path).
    ssq = jnp.sum(o * o, axis=-1, keepdims=True)                          # (b_tile, 1)
    inv = jnp.where(ssq > 0.0, jax.lax.rsqrt(ssq), 1.0)
    o_ref[0] = o * inv                                                    # (b_tile, FCP)


# ----------------------------------------------------------------------------
# Forward wrapper (single jit, single Pallas dispatch)
# ----------------------------------------------------------------------------
@jax.jit
def coarse_decoder_forward(feats, params):
    # feats: (bs, 1024, 7, 7) NCHW f32 -- matches the PyTorch module input.
    bs, c, hh, ww = feats.shape
    assert c == C_IN and hh * ww == S, feats.shape

    b_tile = _pick_b_tile(bs)
    n_steps = pl.cdiv(bs, b_tile)
    bs_pad = n_steps * b_tile
    rows = b_tile * S_PAD

    # NCHW f32 -> channels-last bf16, spatial 49->56, batch -> bs_pad (one fused XLA pass).
    x = jnp.transpose(feats, (0, 2, 3, 1)).reshape(bs, S, C_IN).astype(jnp.bfloat16)
    x = jnp.pad(x, ((0, bs_pad - bs), (0, S_PAD - S), (0, 0)))
    x = x.reshape(bs_pad * S_PAD, C_IN)

    kernel = functools.partial(_coarse_decoder_kernel, b_tile=b_tile)

    out = pl.pallas_call(
        kernel,
        out_shape=jax.ShapeDtypeStruct((n_steps, b_tile, FCP), jnp.float32),
        grid_spec=pltpu.PrefetchScalarGridSpec(
            num_scalar_prefetch=0,
            grid=(n_steps,),
            in_specs=[
                # activations: b_tile*56 rows x 1024 lanes, bf16.
                # (On v6e, bump to pipeline_mode=pl.Buffered(3) if the input DMA shows
                #  up exposed in a trace; v5e/v7x are compute-bound here.)
                pl.BlockSpec((rows, C_IN), lambda b: (b, 0)),
                pl.BlockSpec((C_IN, C_MID), lambda b: (0, 0)),   # conv1 weight, BN1-folded, bf16
                pl.BlockSpec((3, C_MID), lambda b: (0, 0)),      # [bias1; w2*scale2; bias2] f32
                pl.BlockSpec((64, FCP), lambda b: (0, 0)),       # FC weight rows 0..55, bias row 56
            ],
            out_specs=pl.BlockSpec((1, b_tile, FCP), lambda b: (b, 0, 0)),
        ),
        compiler_params=pltpu.CompilerParams(
            dimension_semantics=("parallel",),     # grid steps across v7x TensorCores
            vmem_limit_bytes=32 << 20,             # tiny working set; fits v7x 64 MiB physical
        ),
    )(x, params["w1"], params["vec"], params["fc"])

    return out.reshape(bs_pad, FCP)[:bs, :3]                              # (bs, 3)


# ----------------------------------------------------------------------------
# Deterministic parameter init (synthetic, not a checkpoint).  BN folding, weight
# transpose, padding, merging and bf16 casts are all hoisted here (not per call).
# ----------------------------------------------------------------------------
def init_coarse_decoder_params():
    eps = 1e-5
    key = jax.random.PRNGKey(0)
    ks = jax.random.split(key, 12)

    # conv1: Conv2d(1024, 512, 1) no bias  +  BatchNorm2d(512) eval-mode
    w1 = jax.random.normal(ks[0], (C_MID, C_IN), jnp.float32) * (2.0 / C_IN) ** 0.5
    g1 = 1.0 + 0.1 * jax.random.normal(ks[1], (C_MID,), jnp.float32)
    be1 = 0.1 * jax.random.normal(ks[2], (C_MID,), jnp.float32)
    m1 = 0.1 * jax.random.normal(ks[3], (C_MID,), jnp.float32)
    v1 = jax.random.uniform(ks[4], (C_MID,), jnp.float32, minval=0.5, maxval=1.5)
    scale1 = g1 * jax.lax.rsqrt(v1 + eps)
    bias1 = be1 - m1 * scale1

    # conv2: Conv2d(512, 1, 1) no bias  +  BatchNorm2d(1) eval-mode
    w2 = jax.random.normal(ks[5], (C_MID,), jnp.float32) * (2.0 / C_MID) ** 0.5
    g2 = 1.0 + 0.1 * jax.random.normal(ks[6], (1,), jnp.float32)
    be2 = 0.1 * jax.random.normal(ks[7], (1,), jnp.float32)
    m2 = 0.1 * jax.random.normal(ks[8], (1,), jnp.float32)
    v2 = jax.random.uniform(ks[9], (1,), jnp.float32, minval=0.5, maxval=1.5)
    scale2 = g2 * jax.lax.rsqrt(v2 + eps)
    bias2 = be2 - m2 * scale2

    # fc: Linear(49, 3)
    wfc = jax.random.normal(ks[10], (3, S), jnp.float32) * (1.0 / S) ** 0.5
    bfc = 0.1 * jax.random.normal(ks[11], (3,), jnp.float32)

    # BN1 scale folded into conv1 weight (per output channel), transposed, bf16 MXU operand.
    w1_folded = (w1 * scale1[:, None]).T.astype(jnp.bfloat16)             # (C_IN, C_MID)

    # Small f32 per-channel vectors merged into one (3, C_MID) block:
    #   row 0 = BN1 bias, row 1 = conv2 weight * BN2 scale, row 2 = BN2 bias (replicated).
    vec = jnp.stack(
        [bias1, w2 * scale2[0], jnp.full((C_MID,), bias2[0], jnp.float32)], axis=0)

    # FC weight + bias merged into one sublane/lane-padded (64, 128) block:
    #   rows 0..48 = wfc^T, rows 49..55 = 0 (spatial pad), row 56 = bias, rest 0.
    fc = jnp.zeros((64, FCP), jnp.float32)
    fc = fc.at[:S, :3].set(wfc.T)
    fc = fc.at[S_PAD, :3].set(bfc)

    return {"w1": w1_folded, "vec": vec, "fc": fc}


# ----------------------------------------------------------------------------
# Pure-JAX reference (same folded params; first matmul inputs rounded to bf16 to
# mirror the kernel's MXU datapath, all accumulation/epilogue in f32).
# ----------------------------------------------------------------------------
def reference_forward(feats, params):
    bs = feats.shape[0]
    x = jnp.transpose(feats, (0, 2, 3, 1)).reshape(bs, S, C_IN)
    x = x.astype(jnp.bfloat16).astype(jnp.float32)
    w1 = params["w1"].astype(jnp.float32)                                  # BN1-folded, bf16-rounded
    h = jnp.einsum("bsc,cm->bsm", x, w1, precision=jax.lax.Precision.HIGHEST)
    h = jnp.maximum(h + params["vec"][0], 0.0)                             # (bs, S, C_MID)
    d = jnp.sum(h * params["vec"][1], axis=-1) + params["vec"][2, 0]
    d = jnp.maximum(d, 0.0)                                                # (bs, S)
    wfc = params["fc"][:S, :3]                                             # (S, 3)
    bfc = params["fc"][S_PAD, :3]                                          # (3,)
    o = d @ wfc + bfc                                                      # (bs, 3)
    ssq = jnp.sum(o * o, axis=-1, keepdims=True)
    inv = jnp.where(ssq > 0.0, jax.lax.rsqrt(ssq), 1.0)
    return o * inv


# ----------------------------------------------------------------------------
if __name__ == "__main__":
    BS, H, W = 2, 7, 7                         # Linear(49, 3) fixes spatial to 7x7
    feats = jax.random.normal(jax.random.PRNGKey(0), (BS, C_IN, H, W), jnp.float32)

    params = init_coarse_decoder_params()
    y = coarse_decoder_forward(feats, params)
    y = jax.block_until_ready(y)

    assert y.shape == (BS, 3), y.shape
    assert bool(jnp.all(jnp.isfinite(y)))
    norms = jnp.sqrt(jnp.sum(y * y, axis=-1))
    assert bool(jnp.all(jnp.abs(norms - 1.0) < 1e-3)), norms   # output rows are unit vectors

    y_ref = reference_forward(feats, params)
    assert bool(jnp.allclose(y, y_ref, atol=1e-3, rtol=1e-3)), (y, y_ref)

    print("KERNEL_OK")
</pallas_src>

<mosaic_0001>
module attributes {stable_mosaic.version = 11 : i64} {
  func.func @_coarse_decoder_kernel(%arg0: i32, %arg1: memref<56x1024xbf16, #tpu.memory_space<vmem>>, %arg2: memref<1024x512xbf16, #tpu.memory_space<vmem>>, %arg3: memref<3x512xf32, #tpu.memory_space<vmem>>, %arg4: memref<64x128xf32, #tpu.memory_space<vmem>>, %arg5: memref<1x1x128xf32, #tpu.memory_space<vmem>>) attributes {dimension_semantics = [#tpu.dimension_semantics<parallel>], iteration_bounds = array<i64: 2>, scalar_prefetch = 0 : i64, scratch_operands = 0 : i64, tpu.core_type = #tpu.core_type<tc>, window_params = [{transform_indices = @transform_0, window_bounds = array<i64: 56, 1024>}, {pipeline_mode = #tpu.pipeline_mode<synchronous>, transform_indices = @transform_1, window_bounds = array<i64: 1024, 512>}, {pipeline_mode = #tpu.pipeline_mode<synchronous>, transform_indices = @transform_2, window_bounds = array<i64: 3, 512>}, {pipeline_mode = #tpu.pipeline_mode<synchronous>, transform_indices = @transform_3, window_bounds = array<i64: 64, 128>}, {transform_indices = @transform_4, window_bounds = array<i64: 1, 1, 128>}]} {
    %c0 = arith.constant 0 : index
    %c0_0 = arith.constant 0 : index
    %0 = vector.load %arg1[%c0, %c0_0] : memref<56x1024xbf16, #tpu.memory_space<vmem>>, vector<56x1024xbf16>
    %c0_1 = arith.constant 0 : index
    %c0_2 = arith.constant 0 : index
    %1 = vector.load %arg2[%c0_1, %c0_2] : memref<1024x512xbf16, #tpu.memory_space<vmem>>, vector<1024x512xbf16>
    %cst = arith.constant dense<0.000000e+00> : vector<56x512xf32>
    %2 = tpu.matmul %0, %1, %cst {dimension_numbers = #tpu.dot_dimension_numbers<[1], [0], [0], [1], [0, 0, 1, 1], [], []>} : vector<56x1024xbf16>, vector<1024x512xbf16>, vector<56x512xf32> -> vector<56x512xf32>
    %c0_3 = arith.constant 0 : index
    %c0_4 = arith.constant 0 : index
    %3 = vector.load %arg3[%c0_3, %c0_4] : memref<3x512xf32, #tpu.memory_space<vmem>>, vector<1x512xf32>
    %4 = vector.broadcast %3 : vector<1x512xf32> to vector<56x512xf32>
    %5 = arith.addf %2, %4 : vector<56x512xf32>
    %cst_5 = arith.constant 0.000000e+00 : f32
    %6 = vector.broadcast %cst_5 : f32 to vector<56x512xf32>
    %7 = arith.maximumf %5, %6 : vector<56x512xf32>
    %c1 = arith.constant 1 : index
    %c0_6 = arith.constant 0 : index
    %8 = vector.load %arg3[%c1, %c0_6] : memref<3x512xf32, #tpu.memory_space<vmem>>, vector<1x512xf32>
    %9 = vector.broadcast %8 : vector<1x512xf32> to vector<56x512xf32>
    %10 = arith.mulf %7, %9 : vector<56x512xf32>
    %cst_7 = arith.constant dense<0.000000e+00> : vector<56xf32>
    %11 = vector.multi_reduction <add>, %10, %cst_7 [1] : vector<56x512xf32> to vector<56xf32>
    %12 = vector.shape_cast %11 : vector<56xf32> to vector<56x1xf32>
    %c2 = arith.constant 2 : index
    %c0_8 = arith.constant 0 : index
    %13 = vector.load %arg3[%c2, %c0_8] : memref<3x512xf32, #tpu.memory_space<vmem>>, vector<1x1xf32>
    %14 = vector.broadcast %13 : vector<1x1xf32> to vector<56x1xf32>
    %15 = arith.addf %12, %14 : vector<56x1xf32>
    %cst_9 = arith.constant 0.000000e+00 : f32
    %16 = vector.broadcast %cst_9 : f32 to vector<56x1xf32>
    %17 = arith.maximumf %15, %16 : vector<56x1xf32>
    %18 = vector.shape_cast %17 : vector<56x1xf32> to vector<1x56x1xf32>
    %c0_10 = arith.constant 0 : index
    %c0_11 = arith.constant 0 : index
    %19 = vector.load %arg4[%c0_10, %c0_11] : memref<64x128xf32, #tpu.memory_space<vmem>>, vector<56x128xf32>
    %20 = vector.shape_cast %19 : vector<56x128xf32> to vector<1x56x128xf32>
    %21 = vector.broadcast %18 : vector<1x56x1xf32> to vector<1x56x128xf32>
    %22 = arith.mulf %21, %20 : vector<1x56x128xf32>
    %cst_12 = arith.constant dense<0.000000e+00> : vector<1x128xf32>
    %23 = vector.multi_reduction <add>, %22, %cst_12 [1] : vector<1x56x128xf32> to vector<1x128xf32>
    %c56 = arith.constant 56 : index
    %c0_13 = arith.constant 0 : index
    %24 = vector.load %arg4[%c56, %c0_13] : memref<64x128xf32, #tpu.memory_space<vmem>>, vector<1x128xf32>
    %25 = arith.addf %23, %24 : vector<1x128xf32>
    %26 = arith.mulf %25, %25 : vector<1x128xf32>
    %cst_14 = arith.constant dense<0.000000e+00> : vector<1xf32>
    %27 = vector.multi_reduction <add>, %26, %cst_14 [1] : vector<1x128xf32> to vector<1xf32>
    %28 = vector.shape_cast %27 : vector<1xf32> to vector<1x1xf32>
    %cst_15 = arith.constant 0.000000e+00 : f32
    %29 = vector.broadcast %cst_15 : f32 to vector<1x1xf32>
    %30 = arith.cmpf ogt, %28, %29 : vector<1x1xf32>
    %31 = math.rsqrt %28 : vector<1x1xf32>
    %cst_16 = arith.constant 1.000000e+00 : f32
    %32 = vector.broadcast %cst_16 : f32 to vector<1x1xf32>
    %33 = arith.select %30, %31, %32 : vector<1x1xi1>, vector<1x1xf32>
    %34 = vector.broadcast %33 : vector<1x1xf32> to vector<1x128xf32>
    %35 = arith.mulf %25, %34 : vector<1x128xf32>
    %c0_17 = arith.constant 0 : index
    %c0_18 = arith.constant 0 : index
    %c0_19 = arith.constant 0 : index
    %36 = vector.load %arg5[%c0_17, %c0_18, %c0_19] : memref<1x1x128xf32, #tpu.memory_space<vmem>>, vector<1x1x128xf32>
    %37 = vector.shape_cast %36 : vector<1x1x128xf32> to vector<1x128xf32>
    %38 = vector.shape_cast %35 : vector<1x128xf32> to vector<1x1x128xf32>
    tpu.vector_store %arg5[%c0_17, %c0_18, %c0_19], %38 {strides = array<i32>} : memref<1x1x128xf32, #tpu.memory_space<vmem>>, vector<1x1x128xf32>,
    return
  }
  func.func @transform_0(%arg0: i32) -> (i32, i32) {
    %c0_i32 = arith.constant 0 : i32
    %c0_i32_0 = arith.constant 0 : i32
    return %arg0, %c0_i32 : i32, i32
  }
  func.func @transform_1(%arg0: i32) -> (i32, i32) {
    %c0_i32 = arith.constant 0 : i32
    %c0_i32_0 = arith.constant 0 : i32
    %c0_i32_1 = arith.constant 0 : i32
    return %c0_i32, %c0_i32_0 : i32, i32
  }
  func.func @transform_2(%arg0: i32) -> (i32, i32) {
    %c0_i32 = arith.constant 0 : i32
    %c0_i32_0 = arith.constant 0 : i32
    %c0_i32_1 = arith.constant 0 : i32
    return %c0_i32, %c0_i32_0 : i32, i32
  }
  func.func @transform_3(%arg0: i32) -> (i32, i32) {
    %c0_i32 = arith.constant 0 : i32
    %c0_i32_0 = arith.constant 0 : i32
    %c0_i32_1 = arith.constant 0 : i32
    return %c0_i32, %c0_i32_0 : i32, i32
  }
  func.func @transform_4(%arg0: i32) -> (i32, i32, i32) {
    %c0_i32 = arith.constant 0 : i32
    %c0_i32_0 = arith.constant 0 : i32
    %c0_i32_1 = arith.constant 0 : i32
    return %arg0, %c0_i32, %c0_i32_0 : i32, i32, i32
  }
}

</mosaic_0001>

<bundles_post_ra>
// kernel: coarse_decoder_forward.1
= control target key start
LH: loop header
LB: loop body
LE: loop exit
PB: predicated region body
PF: predicated region fallthrough
CT: control target
= control target key end

     0   :  { %9 = vsyncpa [#allocation3], 0  ;;  %s4753_s0 = inlined_call_operand.vmem [shape: bf16[112,1024], index: 0, kind: input, shape index: {}]   ;;  %s4754_s1 = inlined_call_operand.vmem [shape: bf16[1024,512], index: 1, kind: input, shape index: {}]   ;;  %s4755_s2 = inlined_call_operand.vmem [shape: f32[3,512], index: 2, kind: input, shape index: {}]   ;;  %s4756_s3 = inlined_call_operand.vmem [shape: f32[64,128], index: 3, kind: input, shape index: {}]   ;;  %s4757_s4 = inlined_call_operand.hbm [shape: f32[2,1,128], index: 4, kind: output, shape index: {}]  }
   0x1   :  { %11 = vsyncpa [#allocation3 + $0x1], 0  ;;  %s3727_s15 = smov 0   ;;  %s3729_s16 = smov 0  }
   0x2   :  { %s3731_s17 = smov 0   ;;  %s3733_s18 = smov 0  }
   0x3 LB: > { %s3748_s19 = sadd.s32 4294967295, %s3698_s18   ;;  %s2776_s20 = sadd.s32 4294967294, %s3698_s18   ;;  %s3698_s18 = sphi %s3733_s18, %s4763_s18   ;;  %s3694_s17 = sphi %s3731_s17, %s4762_s17   ;;  %s3690_s16 = sphi %s3729_s16, %s4761_s16   ;;  %s3686_s15 = sphi %s3727_s15, %s4760_s15  }
   0x4   : > { %s3752_s21 = sadd.s32 1, %s3698_s18   ;;  %s113_s22 = sadd.s32 1, %s3694_s17 }
   0x5   : > { %s110_s23 = ssub.s32 %s3698_s18, %s3752_s21  ;;  %p123_p0 = scmp.ne.s32.totalorder %s3694_s17, %s3690_s16 }
   0x6   : > { %p111_p1 = scmp.eq.s32.totalorder %s110_s23, 0  ;;  %p124_p2 = scmp.eq.s32.totalorder %s3748_s19, 1 }
   0x7   : > { %p129_p3 = scmp.ne.s32.totalorder %s3690_s16, %s3686_s15  ;;  %p130_p4 = scmp.eq.s32.totalorder %s2776_s20, 1 }
   0x8   : > { %s3763_s24 = scalar_select %p111_p1, %s3694_s17, %s113_s22  }
   0x9   : > { %p3765_p5 = por %p124_p2, %p123_p0  ;;  %p3769_p6 = por %p130_p4, %p129_p3 }
   0xa   : > { %p2779_p7 = scmp.ge.s32.totalorder %s3698_s18, 1  ;;  %p167_p8 = scmp.lt.s32.totalorder %s3698_s18, 3 }
   0xc   : > { %p168_p9 = pnand %p2779_p7, %p167_p8 }
   0xd   : > { %v3242_v0 = vld [vmem:[%s4754_s1 + $0x4] ss:$16 sps:$4 sm:$0xff] (!%p168_p9)   ;;  %v3244_v1 = vld [vmem:[%s4754_s1 + $0xc] ss:$16 sps:$4 sm:$0xff] (!%p168_p9)   ;;  %v3246_v2 = vld [vmem:[%s4754_s1] ss:$16 sps:$4 sm:$0xff] (!%p168_p9)  }
   0xe   : > { %171 = sbr.rel (%p168_p9) target bundleno = 985 (0x3d9), region = 36  ;;  %1934 = vmatprep.subr.bf16.mxu0 (!%p168_p9), %v3242_v0  ;;  %v3247_v3 = vld [vmem:[%s4754_s1 + $0x8] ss:$16 sps:$4 sm:$0xff] (!%p168_p9)   ;;  %2218 = vmatprep.subr.bf16.mxu1 (!%p168_p9), %v3244_v1  ;;  %v3248_v4 = vld [vmem:[%s4754_s1 + $0x24] ss:$16 sps:$4 sm:$0xff] (!%p168_p9)   ;;  %vm2699_vm0 = vcmask (!%p168_p9), 1040384  }
   0xf   : > { %1935 = vmatpush1.bf16.msra.mxu0 (!%p168_p9), %v3246_v2  ;;  %2219 = vmatpush1.bf16.msra.mxu1 (!%p168_p9), %v3247_v3  ;;  %v3250_v5 = vld [vmem:[%s4754_s1 + $0x2c] ss:$16 sps:$4 sm:$0xff] (!%p168_p9)   ;;  %v3252_v6 = vld [vmem:[%s4754_s1 + $0x20] ss:$16 sps:$4 sm:$0xff] (!%p168_p9)   ;;  %v3253_v7 = vld [vmem:[%s4754_s1 + $0x28] ss:$16 sps:$4 sm:$0xff] (!%p168_p9)  }
  0x10   : > { %1936 = vmatprep.subr.bf16.mxu0 (!%p168_p9), %v3248_v4  ;;  %2220 = vmatprep.subr.bf16.mxu1 (!%p168_p9), %v3250_v5  ;;  %v3254_v8 = vld [vmem:[%s4754_s1 + $0x44] ss:$16 sps:$4 sm:$0xff] (!%p168_p9)   ;;  %v3256_v9 = vld [vmem:[%s4754_s1 + $0x4c] ss:$16 sps:$4 sm:$0xff] (!%p168_p9)   ;;  %v3258_v10 = vld [vmem:[%s4754_s1 + $0x40] ss:$16 sps:$4 sm:$0xff] (!%p168_p9)  }
  0x11   : > { %v3259_v11 = vld [vmem:[%s4754_s1 + $0x48] ss:$16 sps:$4 sm:$0xff] (!%p168_p9)   ;;  %v3260_v12 = vld [vmem:[%s4754_s1 + $0x64] ss:$16 sps:$4 sm:$0xff] (!%p168_p9)   ;;  %v3262_v13 = vld [vmem:[%s4754_s1 + $0x6c] ss:$16 sps:$4 sm:$0xff] (!%p168_p9)  }
  0x12   : > { %v3264_v14 = vld [vmem:[%s4754_s1 + $0x60] ss:$16 sps:$4 sm:$0xff] (!%p168_p9)   ;;  %v3265_v15 = vld [vmem:[%s4754_s1 + $0x68] ss:$16 sps:$4 sm:$0xff] (!%p168_p9)   ;;  %v3266_v16 = vld [vmem:[%s4754_s1 + $0x84] ss:$16 sps:$4 sm:$0xff] (!%p168_p9)  }
  0x13   : > { %1937 = vmatpush1.bf16.msra.mxu0 (!%p168_p9), %v3252_v6  ;;  %2221 = vmatpush1.bf16.msra.mxu1 (!%p168_p9), %v3253_v7  ;;  %v3268_v17 = vld [vmem:[%s4754_s1 + $0x8c] ss:$16 sps:$4 sm:$0xff] (!%p168_p9)   ;;  %v3270_v18 = vld [vmem:[%s4754_s1 + $0x80] ss:$16 sps:$4 sm:$0xff] (!%p168_p9)   ;;  %v3271_v19 = vld [vmem:[%s4754_s1 + $0x88] ss:$16 sps:$4 sm:$0xff] (!%p168_p9)  }
  0x14   : > { %1938 = vmatprep.subr.bf16.mxu0 (!%p168_p9), %v3254_v8  ;;  %2222 = vmatprep.subr.bf16.mxu1 (!%p168_p9), %v3256_v9  ;;  %v3272_v20 = vld [vmem:[%s4754_s1 + $0xa4] ss:$16 sps:$4 sm:$0xff] (!%p168_p9)   ;;  %v3274_v21 = vld [vmem:[%s4754_s1 + $0xac] ss:$16 sps:$4 sm:$0xff] (!%p168_p9)   ;;  %v3276_v22 = vld [vmem:[%s4754_s1 + $0xa0] ss:$16 sps:$4 sm:$0xff] (!%p168_p9)  }
  0x15   : > { %v3277_v23 = vld [vmem:[%s4754_s1 + $0xa8] ss:$16 sps:$4 sm:$0xff]   ;;  %v3278_v24 = vld [vmem:[%s4754_s1 + $0xc4] ss:$16 sps:$4 sm:$0xff]   ;;  %v3280_v25 = vld [vmem:[%s4754_s1 + $0xcc] ss:$16 sps:$4 sm:$0xff]  }
  0x16   : > { %v3282_v26 = vld [vmem:[%s4754_s1 + $0xc0] ss:$16 sps:$4 sm:$0xff]   ;;  %v3283_v27 = vld [vmem:[%s4754_s1 + $0xc8] ss:$16 sps:$4 sm:$0xff]   ;;  %v3284_v28 = vld [vmem:[%s4754_s1 + $0xe4] ss:$16 sps:$4 sm:$0xff]  }
  0x17   : > { %1939 = vmatpush1.bf16.msra.mxu0 %v3258_v10  ;;  %2223 = vmatpush1.bf16.msra.mxu1 %v3259_v11  ;;  %s193_s8 = smul.u32 7, %s3748_s19  ;;  %v3286_v29 = vld [vmem:[%s4754_s1 + $0xec] ss:$16 sps:$4 sm:$0xff]   ;;  %v3288_v30 = vld [vmem:[%s4754_s1 + $0xe0] ss:$16 sps:$4 sm:$0xff]   ;;  %s191_s5 = sand.u32 1, %s3690_s16  }
  0x18   : > { %1940 = vmatprep.subr.bf16.mxu0 %v3260_v12  ;;  %2224 = vmatprep.subr.bf16.mxu1 %v3262_v13  ;;  %v3289_v31 = vld [vmem:[%s4754_s1 + $0xe8] ss:$16 sps:$4 sm:$0xff]   ;;  %v3290_v32 = vld [vmem:[%s4754_s1 + $0x104] ss:$16 sps:$4 sm:$0xff]   ;;  %v3292_v33 = vld [vmem:[%s4754_s1 + $0x10c] ss:$16 sps:$4 sm:$0xff]  }
  0x19   : > { %p194_p10 = scmp.lt.s32.totalorder %s193_s8, 13  ;;  %v3294_v34 = vld [vmem:[%s4754_s1 + $0x100] ss:$16 sps:$4 sm:$0xff]   ;;  %v3295_v35 = vld [vmem:[%s4754_s1 + $0x108] ss:$16 sps:$4 sm:$0xff]   ;;  %s3072_s6 = sshll.u32 %s3748_s19, 4 }
  0x1a   : > { %v3296_v36 = vld [vmem:[%s4754_s1 + $0x124] ss:$16 sps:$4 sm:$0xff]   ;;  %v3298_v37 = vld [vmem:[%s4754_s1 + $0x12c] ss:$16 sps:$4 sm:$0xff]   ;;  %v3300_v38 = vld [vmem:[%s4754_s1 + $0x120] ss:$16 sps:$4 sm:$0xff]   ;;  %s4711_s12 = scalar_lea.hbm %s4757_s4, %s3072_s6 }
  0x1b   : > { %1941 = vmatpush1.bf16.msra.mxu0 %v3264_v14  ;;  %2225 = vmatpush1.bf16.msra.mxu1 %v3265_v15  ;;  %s4765_s8 = smov (!%p194_p10, %s193_s8), 13  ;;  %v3301_v39 = vld [vmem:[%s4754_s1 + $0x128] ss:$16 sps:$4 sm:$0xff]   ;;  %v3302_v40 = vld [vmem:[%s4754_s1 + $0x144] ss:$16 sps:$4 sm:$0xff]   ;;  %s192_s7 = scalar_lea.vmem [#allocation2], %s191_s5 }
  0x1c   : > { %1942 = vmatprep.subr.bf16.mxu0 %v3266_v16  ;;  %2226 = vmatprep.subr.bf16.mxu1 %v3268_v17  ;;  %s3075_s23 = sshll.u32 %s4765_s8, 5  ;;  %v3304_v41 = vld [vmem:[%s4754_s1 + $0x14c] ss:$16 sps:$4 sm:$0xff]   ;;  %v3306_v42 = vld [vmem:[%s4754_s1 + $0x140] ss:$16 sps:$4 sm:$0xff]   ;;  %s2721_s9 = sshll.u32 %s192_s7, 4  ;;  %s4713_s9 = int_to_ptr.vmem [resolvable:$true] %s2721_s9 }
  0x1d   : > { %v3307_v43 = vld [vmem:[%s4754_s1 + $0x148] ss:$16 sps:$4 sm:$0xff]   ;;  %s3911_s10 = scalar_lea.vmem %s4753_s0, %s3075_s23  ;;  %v3308_v44 = vld [vmem:[%s4754_s1 + $0x164] ss:$16 sps:$4 sm:$0xff]   ;;  %v3310_v45 = vld [vmem:[%s4754_s1 + $0x16c] ss:$16 sps:$4 sm:$0xff]  }
  0x1e   : > { %v200_v46 = vld [vmem:[%s3911_s10] sm:$0xff]  ;;  %v3313_v49 = vld [vmem:[%s4754_s1 + $0x168] ss:$16 sps:$4 sm:$0xff]   ;;  %v3316_v52 = vld [vmem:[%s4754_s1 + $0x18c] ss:$16 sps:$4 sm:$0xff]   ;;  %s2709_s13 = scalar_lea.sflag [#allocation3], %s191_s5 }
  0x1f   : > { %1943 = vmatpush1.bf16.msra.mxu0 %v3270_v18  ;;  %2227 = vmatpush1.bf16.msra.mxu1 %v3271_v19  ;;  %v204_v47 = vld [vmem:[%s3911_s10 + $0x20] sm:$0xff]  ;;  %v3319_v54 = vld [vmem:[%s4754_s1 + $0x188] ss:$16 sps:$4 sm:$0xff]   ;;  %v3322_v56 = vld [vmem:[%s4754_s1 + $0x1ac] ss:$16 sps:$4 sm:$0xff]   ;;  %s3636_s14 = scalar_lea.vmem %s4713_s9, 16 }
  0x20   : > { %1944 = vmatprep.subr.bf16.mxu0 %v3272_v20  ;;  %2228 = vmatprep.subr.bf16.mxu1 %v3274_v21  ;;  %v3312_v48 = vld [vmem:[%s4754_s1 + $0x160] ss:$16 sps:$4 sm:$0xff]   ;;  %v2783_v50 = vcombine.high %v200_v46, %v204_v47  ;;  %v3314_v51 = vld [vmem:[%s4754_s1 + $0x184] ss:$16 sps:$4 sm:$0xff]   ;;  %v3325_v58 = vld [vmem:[%s4754_s1 + $0x1a8] ss:$16 sps:$4 sm:$0xff]   ;;  %v2782_v5 = vcombine.low %v200_v46, %v204_v47  ;;  %p3637_p11 = scmp.ne.s32.totalorder %s4713_s9, %s3636_s14 }
  0x21   : > { %v3318_v53 = vld [vmem:[%s4754_s1 + $0x180] ss:$16 sps:$4 sm:$0xff]   ;;  %v3320_v55 = vld [vmem:[%s4754_s1 + $0x1a4] ss:$16 sps:$4 sm:$0xff]   ;;  %v3328_v60 = vld [vmem:[%s4754_s1 + $0x1cc] ss:$16 sps:$4 sm:$0xff]  }
  0x22   : > { %1966 = vmatprep.mubr.bf16.mxu0 %v2783_v50  ;;  %2250 = vmatprep.mubr.bf16.mxu1 %v2783_v50  ;;  %v3324_v57 = vld [vmem:[%s4754_s1 + $0x1a0] ss:$16 sps:$4 sm:$0xff]   ;;  %v3326_v59 = vld [vmem:[%s4754_s1 + $0x1c4] ss:$16 sps:$4 sm:$0xff]   ;;  %v3331_v62 = vld [vmem:[%s4754_s1 + $0x1c8] ss:$16 sps:$4 sm:$0xff]   ;;  %p3638_p12 = pnand %p3637_p11, %p3765_p5 }
  0x23   : > { %1945 = vmatpush1.bf16.msra.mxu0 %v3276_v22  ;;  %2229 = vmatpush1.bf16.msra.mxu1 %v3277_v23  ;;  %v3330_v61 = vld [vmem:[%s4754_s1 + $0x1c0] ss:$16 sps:$4 sm:$0xff]   ;;  %v3332_v63 = vld [vmem:[%s4754_s1 + $0x1e4] ss:$16 sps:$4 sm:$0xff]   ;;  %v3334_v0 = vld [vmem:[%s4754_s1 + $0x1ec] ss:$16 sps:$4 sm:$0xff]  }
  0x24   : > { %1946 = vmatprep.subr.bf16.mxu0 %v3278_v24  ;;  %2230 = vmatprep.subr.bf16.mxu1 %v3280_v25  ;;  %v3336_v1 = vld [vmem:[%s4754_s1 + $0x1e0] ss:$16 sps:$4 sm:$0xff]   ;;  %v3337_v2 = vld [vmem:[%s4754_s1 + $0x1e8] ss:$16 sps:$4 sm:$0xff]   ;;  %v3340_v3 = vld [vmem:[%s4754_s1 + $0x204] ss:$16 sps:$4 sm:$0xff]   ;;  %p3639_p13 = pneg %p3638_p12 }
  0x25   : > { %v3343_v4 = vld [vmem:[%s4754_s1 + $0x20c] ss:$16 sps:$4 sm:$0xff]   ;;  %v3338_v6 = vld [vmem:[%s4754_s1 + $0x200] ss:$16 sps:$4 sm:$0xff]   ;;  %v3341_v7 = vld [vmem:[%s4754_s1 + $0x208] ss:$16 sps:$4 sm:$0xff]  }
  0x26   : > { %v3346_v8 = vld [vmem:[%s4754_s1 + $0x224] ss:$16 sps:$4 sm:$0xff]   ;;  %v3349_v9 = vld [vmem:[%s4754_s1 + $0x22c] ss:$16 sps:$4 sm:$0xff]   ;;  %v3344_v10 = vld [vmem:[%s4754_s1 + $0x220] ss:$16 sps:$4 sm:$0xff]  }
  0x27   : > { %1947 = vmatpush1.bf16.msra.mxu0 %v3282_v26  ;;  %2231 = vmatpush1.bf16.msra.mxu1 %v3283_v27  ;;  %v3347_v11 = vld [vmem:[%s4754_s1 + $0x228] ss:$16 sps:$4 sm:$0xff]   ;;  %v3352_v12 = vld [vmem:[%s4754_s1 + $0x244] ss:$16 sps:$4 sm:$0xff]   ;;  %v3355_v13 = vld [vmem:[%s4754_s1 + $0x24c] ss:$16 sps:$4 sm:$0xff]  }
  0x28   : > { %1948 = vmatprep.subr.bf16.mxu0 %v3284_v28  ;;  %2232 = vmatprep.subr.bf16.mxu1 %v3286_v29  ;;  %v208_v14 = vld [vmem:[%s3911_s10 + $0x40] sm:$0xff]  ;;  %v3353_v17 = vld [vmem:[%s4754_s1 + $0x248] ss:$16 sps:$4 sm:$0xff]   ;;  %v3361_v21 = vld [vmem:[%s4754_s1 + $0x26c] ss:$16 sps:$4 sm:$0xff]   ;;  %s3701_s19 = smov [#allocation2]  }
  0x29   : > { %v212_v15 = vld [vmem:[%s3911_s10 + $0x60] sm:$0xff]  ;;  %v3359_v23 = vld [vmem:[%s4754_s1 + $0x268] ss:$16 sps:$4 sm:$0xff]   ;;  %v3367_v27 = vld [vmem:[%s4754_s1 + $0x28c] ss:$16 sps:$4 sm:$0xff]   ;;  %s3640_s20 = sshll.u32 %s3701_s19, 4  ;;  %s3641_s20 = int_to_ptr.vmem [resolvable:$false] %s3640_s20 }
  0x2a   : > { %v3350_v16 = vld [vmem:[%s4754_s1 + $0x240] ss:$16 sps:$4 sm:$0xff]   ;;  %v2791_v18 = vcombine.high %v208_v14, %v212_v15  ;;  %v2790_v19 = vcombine.low %v208_v14, %v212_v15  ;;  %v3358_v20 = vld [vmem:[%s4754_s1 + $0x264] ss:$16 sps:$4 sm:$0xff]   ;;  %v3385_v46 = vld [vmem:[%s4754_s1 + $0x2ec] ss:$16 sps:$4 sm:$0xff]   ;;  %p3643_p0 = scmp.lt.s32.totalorder %s4713_s9, %s3641_s20 }
  0x2b   : > { %1949 = vmatpush1.bf16.msra.mxu0 %v3288_v30  ;;  %2233 = vmatpush1.bf16.msra.mxu1 %v3289_v31  ;;  %v3356_v22 = vld [vmem:[%s4754_s1 + $0x260] ss:$16 sps:$4 sm:$0xff]   ;;  %v3364_v26 = vld [vmem:[%s4754_s1 + $0x284] ss:$16 sps:$4 sm:$0xff]   ;;  %v3365_v31 = vld [vmem:[%s4754_s1 + $0x288] ss:$16 sps:$4 sm:$0xff]  }
  0x2c   : > { %1950 = vmatprep.subr.bf16.mxu0 %v3290_v32  ;;  %2234 = vmatprep.subr.bf16.mxu1 %v3292_v33  ;;  %v216_v24 = vld [vmem:[%s3911_s10 + $0x80] sm:$0xff]  ;;  %v3373_v33 = vld [vmem:[%s4754_s1 + $0x2ac] ss:$16 sps:$4 sm:$0xff]   ;;  %s3642_s22 = scalar_lea.vmem %s3641_s20, 32 }
  0x2d   : > { %v220_v25 = vld [vmem:[%s3911_s10 + $0xa0] sm:$0xff]  ;;  %v3435_v15 = vld [vmem:[%s4754_s1 + $0x3ec] ss:$16 sps:$4 sm:$0xff]   ;;  %p3644_p1 = scmp.lt.s32.totalorder %s3642_s22, %s3636_s14 }
  0x2e   : > { %v2799_v28 = vcombine.high %v216_v24, %v220_v25  ;;  %v2798_v29 = vcombine.low %v216_v24, %v220_v25  ;;  %v3362_v30 = vld [vmem:[%s4754_s1 + $0x280] ss:$16 sps:$4 sm:$0xff]   ;;  %v3370_v32 = vld [vmem:[%s4754_s1 + $0x2a4] ss:$16 sps:$4 sm:$0xff]   ;;  %v3439_v24 = vld [vmem:[%s4754_s1 + $0x408] ss:$16 sps:$4 sm:$0xff]  }
  0x2f   : > { %1951 = vmatpush1.bf16.msra.mxu0 %v3294_v34  ;;  %2235 = vmatpush1.bf16.msra.mxu1 %v3295_v35  ;;  %v224_v34 = vld [vmem:[%s3911_s10 + $0xc0] sm:$0xff]  ;;  %p3645_p2 = por %p3644_p1, %p3643_p0 }
  0x30   : > { %1952 = vmatprep.subr.bf16.mxu0 %v3296_v36  ;;  %2236 = vmatprep.subr.bf16.mxu1 %v3298_v37  ;;  %v3368_v35 = vld [vmem:[%s4754_s1 + $0x2a0] ss:$16 sps:$4 sm:$0xff]   ;;  %v2807_v36 = vcombine.high %v224_v34, %v224_v34  ;;  %v3371_v37 = vld [vmem:[%s4754_s1 + $0x2a8] ss:$16 sps:$4 sm:$0xff]   ;;  %v3388_v50 = vld [vmem:[%s4754_s1 + $0x304] ss:$16 sps:$4 sm:$0xff]  }
  0x31   : > { %v3432_v14 = vld [vmem:[%s4754_s1 + $0x3e4] ss:$16 sps:$4 sm:$0xff]   ;;  %p3646_p3 = pnand %p3645_p2, %p3639_p13 }
  0x32   : > { %v3444_v25 = vld [vmem:[%s4754_s1 + $0x424] ss:$16 sps:$4 sm:$0xff]  }
  0x33   : > { %1953 = vmatpush1.bf16.msra.mxu0 %v3300_v38  ;;  %2237 = vmatpush1.bf16.msra.mxu1 %v3301_v39  ;;  %v3376_v38 = vld [vmem:[%s4754_s1 + $0x2c4] ss:$16 sps:$4 sm:$0xff]   ;;  %v3379_v39 = vld [vmem:[%s4754_s1 + $0x2cc] ss:$16 sps:$4 sm:$0xff]  }
  0x34   : > { %1954 = vmatprep.subr.bf16.mxu0 %v3302_v40  ;;  %2238 = vmatprep.subr.bf16.mxu1 %v3304_v41  ;;  %v3374_v40 = vld [vmem:[%s4754_s1 + $0x2c0] ss:$16 sps:$4 sm:$0xff]   ;;  %v3377_v41 = vld [vmem:[%s4754_s1 + $0x2c8] ss:$16 sps:$4 sm:$0xff]  }
  0x37   : > { %1955 = vmatpush1.bf16.msra.mxu0 %v3306_v42  ;;  %2239 = vmatpush1.bf16.msra.mxu1 %v3307_v43  ;;  %v2806_v42 = vcombine.low %v224_v34, %v224_v34  ;;  %v4065_v43 = vld [vmem:[%s3911_s10 + $0x8] sm:$0xff] }
  0x38   : > { %1956 = vmatprep.subr.bf16.mxu0 %v3308_v44  ;;  %2240 = vmatprep.subr.bf16.mxu1 %v3310_v45  ;;  %v4068_v44 = vld [vmem:[%s3911_s10 + $0x28] sm:$0xff]  ;;  %v3382_v45 = vld [vmem:[%s4754_s1 + $0x2e4] ss:$16 sps:$4 sm:$0xff]  }
  0x39   : > { %v2785_v47 = vcombine.high %v4065_v43, %v4068_v44 }
  0x3b   : > { %1957 = vmatpush1.bf16.msra.mxu0 %v3312_v48  ;;  %2241 = vmatpush1.bf16.msra.mxu1 %v3313_v49  ;;  %v3380_v48 = vld [vmem:[%s4754_s1 + $0x2e0] ss:$16 sps:$4 sm:$0xff]   ;;  %v3383_v49 = vld [vmem:[%s4754_s1 + $0x2e8] ss:$16 sps:$4 sm:$0xff]  }
  0x3c   : > { %1958 = vmatprep.subr.bf16.mxu0 %v3314_v51  ;;  %2242 = vmatprep.subr.bf16.mxu1 %v3316_v52  ;;  %v3391_v51 = vld [vmem:[%s4754_s1 + $0x30c] ss:$16 sps:$4 sm:$0xff]   ;;  %v3386_v52 = vld [vmem:[%s4754_s1 + $0x300] ss:$16 sps:$4 sm:$0xff]  }
  0x3f   : > { %1959 = vmatpush1.bf16.msra.mxu0 %v3318_v53  ;;  %2243 = vmatpush1.bf16.msra.mxu1 %v3319_v54  ;;  %v3389_v53 = vld [vmem:[%s4754_s1 + $0x308] ss:$16 sps:$4 sm:$0xff]   ;;  %v3394_v54 = vld [vmem:[%s4754_s1 + $0x324] ss:$16 sps:$4 sm:$0xff]  }
  0x40   : > { %1960 = vmatprep.subr.bf16.mxu0 %v3320_v55  ;;  %2244 = vmatprep.subr.bf16.mxu1 %v3322_v56  ;;  %v3397_v55 = vld [vmem:[%s4754_s1 + $0x32c] ss:$16 sps:$4 sm:$0xff]   ;;  %v3392_v56 = vld [vmem:[%s4754_s1 + $0x320] ss:$16 sps:$4 sm:$0xff]  }
  0x43   : > { %1961 = vmatpush1.bf16.msra.mxu0 %v3324_v57  ;;  %2245 = vmatpush1.bf16.msra.mxu1 %v3325_v58  ;;  %v3395_v57 = vld [vmem:[%s4754_s1 + $0x328] ss:$16 sps:$4 sm:$0xff]   ;;  %v3400_v58 = vld [vmem:[%s4754_s1 + $0x344] ss:$16 sps:$4 sm:$0xff]  }
  0x44   : > { %1962 = vmatprep.subr.bf16.mxu0 %v3326_v59  ;;  %2246 = vmatprep.subr.bf16.mxu1 %v3328_v60  ;;  %v3403_v59 = vld [vmem:[%s4754_s1 + $0x34c] ss:$16 sps:$4 sm:$0xff]   ;;  %v3398_v60 = vld [vmem:[%s4754_s1 + $0x340] ss:$16 sps:$4 sm:$0xff]  }
  0x47   : > { %1963 = vmatpush1.bf16.msra.mxu0 %v3330_v61  ;;  %2247 = vmatpush1.bf16.msra.mxu1 %v3331_v62  ;;  %v3401_v61 = vld [vmem:[%s4754_s1 + $0x348] ss:$16 sps:$4 sm:$0xff]   ;;  %v3406_v62 = vld [vmem:[%s4754_s1 + $0x364] ss:$16 sps:$4 sm:$0xff]  }
  0x48   : > { %1964 = vmatprep.subr.bf16.mxu0 %v3332_v63  ;;  %2248 = vmatprep.subr.bf16.mxu1 %v3334_v0  ;;  %v3409_v63 = vld [vmem:[%s4754_s1 + $0x36c] ss:$16 sps:$4 sm:$0xff]   ;;  %v3404_v0 = vld [vmem:[%s4754_s1 + $0x360] ss:$16 sps:$4 sm:$0xff]  }
  0x4b   : > { %1965 = vmatpush1.bf16.msra.mxu0 %v3336_v1  ;;  %2249 = vmatpush1.bf16.msra.mxu1 %v3337_v2  ;;  %v3407_v1 = vld [vmem:[%s4754_s1 + $0x368] ss:$16 sps:$4 sm:$0xff]   ;;  %v3412_v2 = vld [vmem:[%s4754_s1 + $0x384] ss:$16 sps:$4 sm:$0xff]  }
  0x4c   : > { %2005 = vmatprep.subr.bf16.mxu0 %v3340_v3  ;;  %2289 = vmatprep.subr.bf16.mxu1 %v3343_v4  ;;  %v3415_v3 = vld [vmem:[%s4754_s1 + $0x38c] ss:$16 sps:$4 sm:$0xff]   ;;  %v3410_v4 = vld [vmem:[%s4754_s1 + $0x380] ss:$16 sps:$4 sm:$0xff]  }
  0x4e   : > { %1967 = vmatmul.mubr.bf16.vlgmr.msra.gmra.mrb[0].mxu0 %v2782_v5  ;;  %2251 = vmatmul.mubr.bf16.vlgmr.msra.gmra.mrb[0].mxu1 %v2782_v5  ;;  %v3413_v5 = vld [vmem:[%s4754_s1 + $0x388] ss:$16 sps:$4 sm:$0xff]  }
  0x4f   : > { %2006 = vmatpush1.bf16.msra.mxu0 %v3338_v6  ;;  %2290 = vmatpush1.bf16.msra.mxu1 %v3341_v7  ;;  %v3418_v6 = vld [vmem:[%s4754_s1 + $0x3a4] ss:$16 sps:$4 sm:$0xff]   ;;  %v3421_v7 = vld [vmem:[%s4754_s1 + $0x3ac] ss:$16 sps:$4 sm:$0xff]  }
  0x50   : > { %2007 = vmatprep.subr.bf16.mxu0 %v3346_v8  ;;  %2291 = vmatprep.subr.bf16.mxu1 %v3349_v9  ;;  %v3416_v8 = vld [vmem:[%s4754_s1 + $0x3a0] ss:$16 sps:$4 sm:$0xff]   ;;  %v3419_v9 = vld [vmem:[%s4754_s1 + $0x3a8] ss:$16 sps:$4 sm:$0xff]  }
  0x51   : > { %1976 = vmatprep.mubr.bf16.mxu0 %v2791_v18  ;;  %2260 = vmatprep.mubr.bf16.mxu1 %v2791_v18  ;;  %v3438_v18 = vld [vmem:[%s4754_s1 + $0x404] ss:$16 sps:$4 sm:$0xff]  }
  0x53   : > { %2008 = vmatpush1.bf16.msra.mxu0 %v3344_v10  ;;  %2292 = vmatpush1.bf16.msra.mxu1 %v3347_v11  ;;  %v3425_v10 = vld [vmem:[%s4754_s1 + $0x3c4] ss:$16 sps:$4 sm:$0xff]   ;;  %v3428_v11 = vld [vmem:[%s4754_s1 + $0x3cc] ss:$16 sps:$4 sm:$0xff]  }
  0x54   : > { %2009 = vmatprep.subr.bf16.mxu0 %v3352_v12  ;;  %2293 = vmatprep.subr.bf16.mxu1 %v3355_v13  ;;  %v3423_v12 = vld [vmem:[%s4754_s1 + $0x3c0] ss:$16 sps:$4 sm:$0xff]   ;;  %v3426_v13 = vld [vmem:[%s4754_s1 + $0x3c8] ss:$16 sps:$4 sm:$0xff]  }
  0x56   : > { %1977 = vmatmul.mubr.bf16.gmra.mrb[4].mxu0 %v2790_v19  ;;  %2261 = vmatmul.mubr.bf16.gmra.mrb[4].mxu1 %v2790_v19  ;;  %v3441_v19 = vld [vmem:[%s4754_s1 + $0x40c] ss:$16 sps:$4 sm:$0xff]  }
  0x57   : > { %2010 = vmatpush1.bf16.msra.mxu0 %v3350_v16  ;;  %2294 = vmatpush1.bf16.msra.mxu1 %v3353_v17  ;;  %v3430_v16 = vld [vmem:[%s4754_s1 + $0x3e0] ss:$16 sps:$4 sm:$0xff]   ;;  %v3433_v17 = vld [vmem:[%s4754_s1 + $0x3e8] ss:$16 sps:$4 sm:$0xff]  }
  0x58   : > { %2011 = vmatprep.subr.bf16.mxu0 %v3358_v20  ;;  %2295 = vmatprep.subr.bf16.mxu1 %v3361_v21  ;;  %v209_v20 = vld [vmem:[%s3911_s10 + $0x48] sm:$0xff]  ;;  %v2784_v21 = vcombine.low %v4065_v43, %v4068_v44  ;;  %v3460_v44 = vld [vmem:[%s4754_s1 + $0x480] ss:$16 sps:$4 sm:$0xff]  }
  0x59   : > { %1986 = vmatprep.mubr.bf16.mxu0 %v2799_v28  ;;  %2270 = vmatprep.mubr.bf16.mxu1 %v2799_v28  ;;  %v3442_v28 = vld [vmem:[%s4754_s1 + $0x420] ss:$16 sps:$4 sm:$0xff]   ;;  %v3465_v43 = vld [vmem:[%s4754_s1 + $0x48c] ss:$16 sps:$4 sm:$0xff]  }
  0x5b   : > { %2012 = vmatpush1.bf16.msra.mxu0 %v3356_v22  ;;  %2296 = vmatpush1.bf16.msra.mxu1 %v3359_v23  ;;  %v213_v22 = vld [vmem:[%s3911_s10 + $0x68] sm:$0xff]  ;;  %v3436_v23 = vld [vmem:[%s4754_s1 + $0x400] ss:$16 sps:$4 sm:$0xff]  }
  0x5c   : > { %2013 = vmatprep.subr.bf16.mxu0 %v3364_v26  ;;  %2297 = vmatprep.subr.bf16.mxu1 %v3367_v27  ;;  %v3447_v26 = vld [vmem:[%s4754_s1 + $0x42c] ss:$16 sps:$4 sm:$0xff]   ;;  %v2793_v27 = vcombine.high %v209_v20, %v213_v22  ;;  %v2792_v34 = vcombine.low %v209_v20, %v213_v22  ;;  %v3511_v20 = vld [vmem:[%s4754_s1 + $0x588] ss:$16 sps:$4 sm:$0xff]  }
  0x5d   : > { %v3519_v22 = vld [vmem:[%s4754_s1 + $0x5ac] ss:$16 sps:$4 sm:$0xff]  }
  0x5e   : > { %1987 = vmatmul.mubr.bf16.gmra.mrb[8].mxu0 %v2798_v29  ;;  %2271 = vmatmul.mubr.bf16.gmra.mrb[8].mxu1 %v2798_v29  ;;  %v3445_v29 = vld [vmem:[%s4754_s1 + $0x428] ss:$16 sps:$4 sm:$0xff]  }
  0x5f   : > { %2014 = vmatpush1.bf16.msra.mxu0 %v3362_v30  ;;  %2298 = vmatpush1.bf16.msra.mxu1 %v3365_v31  ;;  %v3450_v30 = vld [vmem:[%s4754_s1 + $0x444] ss:$16 sps:$4 sm:$0xff]   ;;  %v3453_v31 = vld [vmem:[%s4754_s1 + $0x44c] ss:$16 sps:$4 sm:$0xff]  }
  0x60   : > { %2015 = vmatprep.subr.bf16.mxu0 %v3370_v32  ;;  %2299 = vmatprep.subr.bf16.mxu1 %v3373_v33  ;;  %v3448_v32 = vld [vmem:[%s4754_s1 + $0x440] ss:$16 sps:$4 sm:$0xff]   ;;  %v3451_v33 = vld [vmem:[%s4754_s1 + $0x448] ss:$16 sps:$4 sm:$0xff]  }
  0x61   : > { %1996 = vmatprep.mubr.bf16.mxu0 %v2807_v36  ;;  %2280 = vmatprep.mubr.bf16.mxu1 %v2807_v36  ;;  %v221_v36 = vld [vmem:[%s3911_s10 + $0xa8] sm:$0xff] }
  0x63   : > { %2016 = vmatpush1.bf16.msra.mxu0 %v3368_v35  ;;  %2300 = vmatpush1.bf16.msra.mxu1 %v3371_v37  ;;  %v217_v35 = vld [vmem:[%s3911_s10 + $0x88] sm:$0xff]  ;;  %v3456_v37 = vld [vmem:[%s4754_s1 + $0x464] ss:$16 sps:$4 sm:$0xff]  }
  0x64   : > { %2017 = vmatprep.subr.bf16.mxu0 %v3376_v38  ;;  %2301 = vmatprep.subr.bf16.mxu1 %v3379_v39  ;;  %v3459_v38 = vld [vmem:[%s4754_s1 + $0x46c] ss:$16 sps:$4 sm:$0xff]   ;;  %v2801_v39 = vcombine.high %v217_v35, %v221_v36 }
  0x66   : > { %1997 = vmatmul.mubr.bf16.gmra.mrb[12].mxu0 %v2806_v42  ;;  %2281 = vmatmul.mubr.bf16.gmra.mrb[12].mxu1 %v2806_v42  ;;  %v3462_v42 = vld [vmem:[%s4754_s1 + $0x484] ss:$16 sps:$4 sm:$0xff]  }
  0x67   : > { %2018 = vmatpush1.bf16.msra.mxu0 %v3374_v40  ;;  %2302 = vmatpush1.bf16.msra.mxu1 %v3377_v41  ;;  %v3454_v40 = vld [vmem:[%s4754_s1 + $0x460] ss:$16 sps:$4 sm:$0xff]   ;;  %v3457_v41 = vld [vmem:[%s4754_s1 + $0x468] ss:$16 sps:$4 sm:$0xff]  }
  0x68   : > { %2019 = vmatprep.subr.bf16.mxu0 %v3382_v45  ;;  %2303 = vmatprep.subr.bf16.mxu1 %v3385_v46  ;;  %v3463_v45 = vld [vmem:[%s4754_s1 + $0x488] ss:$16 sps:$4 sm:$0xff]   ;;  %v2800_v46 = vcombine.low %v217_v35, %v221_v36  ;;  %v210_v36 = vld [vmem:[%s3911_s10 + $0x50] sm:$0xff] }
  0x69   : > { %2037 = vmatprep.mubr.bf16.mxu0 %v2785_v47  ;;  %2321 = vmatprep.mubr.bf16.mxu1 %v2785_v47  ;;  %v225_v47 = vld [vmem:[%s3911_s10 + $0xc8] sm:$0xff] }
  0x6b   : > { %2020 = vmatpush1.bf16.msra.mxu0 %v3380_v48  ;;  %2304 = vmatpush1.bf16.msra.mxu1 %v3383_v49  ;;  %v3468_v48 = vld [vmem:[%s4754_s1 + $0x4a4] ss:$16 sps:$4 sm:$0xff]   ;;  %v3471_v49 = vld [vmem:[%s4754_s1 + $0x4ac] ss:$16 sps:$4 sm:$0xff]  }
  0x6c   : > { %2021 = vmatprep.subr.bf16.mxu0 %v3388_v50  ;;  %2305 = vmatprep.subr.bf16.mxu1 %v3391_v51  ;;  %v2809_v50 = vcombine.high %v225_v47, %v225_v47  ;;  %v3466_v51 = vld [vmem:[%s4754_s1 + $0x4a0] ss:$16 sps:$4 sm:$0xff]  }
  0x6f   : > { %2022 = vmatpush1.bf16.msra.mxu0 %v3386_v52  ;;  %2306 = vmatpush1.bf16.msra.mxu1 %v3389_v53  ;;  %v3469_v52 = vld [vmem:[%s4754_s1 + $0x4a8] ss:$16 sps:$4 sm:$0xff]   ;;  %v3474_v53 = vld [vmem:[%s4754_s1 + $0x4c4] ss:$16 sps:$4 sm:$0xff]  }
  0x70   : > { %2023 = vmatprep.subr.bf16.mxu0 %v3394_v54  ;;  %2307 = vmatprep.subr.bf16.mxu1 %v3397_v55  ;;  %v3477_v54 = vld [vmem:[%s4754_s1 + $0x4cc] ss:$16 sps:$4 sm:$0xff]   ;;  %v3472_v55 = vld [vmem:[%s4754_s1 + $0x4c0] ss:$16 sps:$4 sm:$0xff]  }
  0x73   : > { %2024 = vmatpush1.bf16.msra.mxu0 %v3392_v56  ;;  %2308 = vmatpush1.bf16.msra.mxu1 %v3395_v57  ;;  %v3475_v56 = vld [vmem:[%s4754_s1 + $0x4c8] ss:$16 sps:$4 sm:$0xff]   ;;  %v2808_v57 = vcombine.low %v225_v47, %v225_v47 }
  0x74   : > { %2025 = vmatprep.subr.bf16.mxu0 %v3400_v58  ;;  %2309 = vmatprep.subr.bf16.mxu1 %v3403_v59  ;;  %v4272_v58 = vld [vmem:[%s3911_s10 + $0x10] sm:$0xff] }
  0x75   : > { %v4275_v59 = vld [vmem:[%s3911_s10 + $0x30] sm:$0xff] }
  0x76   : > { %v2786_v35 = vcombine.low %v4272_v58, %v4275_v59 }
  0x77   : > { %2026 = vmatpush1.bf16.msra.mxu0 %v3398_v60  ;;  %2310 = vmatpush1.bf16.msra.mxu1 %v3401_v61  ;;  %v3480_v60 = vld [vmem:[%s4754_s1 + $0x4e4] ss:$16 sps:$4 sm:$0xff]   ;;  %v3483_v61 = vld [vmem:[%s4754_s1 + $0x4ec] ss:$16 sps:$4 sm:$0xff]  }
  0x78   : > { %2027 = vmatprep.subr.bf16.mxu0 %v3406_v62  ;;  %2311 = vmatprep.subr.bf16.mxu1 %v3409_v63  ;;  %v2787_v62 = vcombine.high %v4272_v58, %v4275_v59  ;;  %v3478_v63 = vld [vmem:[%s4754_s1 + $0x4e0] ss:$16 sps:$4 sm:$0xff]   ;;  %v3563_v58 = vld [vmem:[%s4754_s1 + $0x68c] ss:$16 sps:$4 sm:$0xff]  }
  0x7b   : > { %2028 = vmatpush1.bf16.msra.mxu0 %v3404_v0  ;;  %2312 = vmatpush1.bf16.msra.mxu1 %v3407_v1  ;;  %v3481_v0 = vld [vmem:[%s4754_s1 + $0x4e8] ss:$16 sps:$4 sm:$0xff]   ;;  %v3486_v1 = vld [vmem:[%s4754_s1 + $0x504] ss:$16 sps:$4 sm:$0xff]  }
  0x7c   : > { %2029 = vmatprep.subr.bf16.mxu0 %v3412_v2  ;;  %2313 = vmatprep.subr.bf16.mxu1 %v3415_v3  ;;  %v3489_v2 = vld [vmem:[%s4754_s1 + $0x50c] ss:$16 sps:$4 sm:$0xff]   ;;  %v3484_v3 = vld [vmem:[%s4754_s1 + $0x500] ss:$16 sps:$4 sm:$0xff]  }
  0x7f   : > { %2030 = vmatpush1.bf16.msra.mxu0 %v3410_v4  ;;  %2314 = vmatpush1.bf16.msra.mxu1 %v3413_v5  ;;  %v3487_v4 = vld [vmem:[%s4754_s1 + $0x508] ss:$16 sps:$4 sm:$0xff]   ;;  %v3492_v5 = vld [vmem:[%s4754_s1 + $0x524] ss:$16 sps:$4 sm:$0xff]  }
  0x80   : > { %2031 = vmatprep.subr.bf16.mxu0 %v3418_v6  ;;  %2315 = vmatprep.subr.bf16.mxu1 %v3421_v7  ;;  %v3495_v6 = vld [vmem:[%s4754_s1 + $0x52c] ss:$16 sps:$4 sm:$0xff]   ;;  %v3490_v7 = vld [vmem:[%s4754_s1 + $0x520] ss:$16 sps:$4 sm:$0xff]  }
  0x83   : > { %2032 = vmatpush1.bf16.msra.mxu0 %v3416_v8  ;;  %2316 = vmatpush1.bf16.msra.mxu1 %v3419_v9  ;;  %v3493_v8 = vld [vmem:[%s4754_s1 + $0x528] ss:$16 sps:$4 sm:$0xff]   ;;  %v3498_v9 = vld [vmem:[%s4754_s1 + $0x544] ss:$16 sps:$4 sm:$0xff]  }
  0x84   : > { %2033 = vmatprep.subr.bf16.mxu0 %v3425_v10  ;;  %2317 = vmatprep.subr.bf16.mxu1 %v3428_v11  ;;  %v3501_v10 = vld [vmem:[%s4754_s1 + $0x54c] ss:$16 sps:$4 sm:$0xff]   ;;  %v3496_v11 = vld [vmem:[%s4754_s1 + $0x540] ss:$16 sps:$4 sm:$0xff]  }
  0x87   : > { %2034 = vmatpush1.bf16.msra.mxu0 %v3423_v12  ;;  %2318 = vmatpush1.bf16.msra.mxu1 %v3426_v13  ;;  %v3499_v12 = vld [vmem:[%s4754_s1 + $0x548] ss:$16 sps:$4 sm:$0xff]   ;;  %v3504_v13 = vld [vmem:[%s4754_s1 + $0x564] ss:$16 sps:$4 sm:$0xff]  }
  0x88   : > { %2035 = vmatprep.subr.bf16.mxu0 %v3432_v14  ;;  %2319 = vmatprep.subr.bf16.mxu1 %v3435_v15  ;;  %v3507_v14 = vld [vmem:[%s4754_s1 + $0x56c] ss:$16 sps:$4 sm:$0xff]   ;;  %v3502_v15 = vld [vmem:[%s4754_s1 + $0x560] ss:$16 sps:$4 sm:$0xff]  }
  0x8b   : > { %2036 = vmatpush1.bf16.msra.mxu0 %v3430_v16  ;;  %2320 = vmatpush1.bf16.msra.mxu1 %v3433_v17  ;;  %v3505_v16 = vld [vmem:[%s4754_s1 + $0x568] ss:$16 sps:$4 sm:$0xff]   ;;  %v3510_v17 = vld [vmem:[%s4754_s1 + $0x584] ss:$16 sps:$4 sm:$0xff]  }
  0x8c   : > { %2076 = vmatprep.subr.bf16.mxu0 %v3438_v18  ;;  %2360 = vmatprep.subr.bf16.mxu1 %v3441_v19  ;;  %v3513_v18 = vld [vmem:[%s4754_s1 + $0x58c] ss:$16 sps:$4 sm:$0xff]   ;;  %v3508_v19 = vld [vmem:[%s4754_s1 + $0x580] ss:$16 sps:$4 sm:$0xff]  }
  0x8e   : > { %2038 = vmatmul.mubr.bf16.vlgmr.msra.gmra.mrb[0].mxu0 %v2784_v21  ;;  %2322 = vmatmul.mubr.bf16.vlgmr.msra.gmra.mrb[0].mxu1 %v2784_v21  ;;  %v3516_v21 = vld [vmem:[%s4754_s1 + $0x5a4] ss:$16 sps:$4 sm:$0xff]  }
  0x8f   : > { %2077 = vmatpush1.bf16.msra.mxu0 %v3436_v23  ;;  %2361 = vmatpush1.bf16.msra.mxu1 %v3439_v24  ;;  %v3514_v23 = vld [vmem:[%s4754_s1 + $0x5a0] ss:$16 sps:$4 sm:$0xff]   ;;  %v3517_v24 = vld [vmem:[%s4754_s1 + $0x5a8] ss:$16 sps:$4 sm:$0xff]  }
  0x90   : > { %2078 = vmatprep.subr.bf16.mxu0 %v3444_v25  ;;  %2362 = vmatprep.subr.bf16.mxu1 %v3447_v26  ;;  %v3523_v25 = vld [vmem:[%s4754_s1 + $0x5c4] ss:$16 sps:$4 sm:$0xff]   ;;  %v3526_v26 = vld [vmem:[%s4754_s1 + $0x5cc] ss:$16 sps:$4 sm:$0xff]  }
  0x91   : > { %2047 = vmatprep.mubr.bf16.mxu0 %v2793_v27  ;;  %2331 = vmatprep.mubr.bf16.mxu1 %v2793_v27  ;;  %v3521_v27 = vld [vmem:[%s4754_s1 + $0x5c0] ss:$16 sps:$4 sm:$0xff]  }
  0x93   : > { %2079 = vmatpush1.bf16.msra.mxu0 %v3442_v28  ;;  %2363 = vmatpush1.bf16.msra.mxu1 %v3445_v29  ;;  %v3524_v28 = vld [vmem:[%s4754_s1 + $0x5c8] ss:$16 sps:$4 sm:$0xff]   ;;  %v3530_v29 = vld [vmem:[%s4754_s1 + $0x5e4] ss:$16 sps:$4 sm:$0xff]  }
  0x94   : > { %2080 = vmatprep.subr.bf16.mxu0 %v3450_v30  ;;  %2364 = vmatprep.subr.bf16.mxu1 %v3453_v31  ;;  %v3533_v30 = vld [vmem:[%s4754_s1 + $0x5ec] ss:$16 sps:$4 sm:$0xff]   ;;  %v3528_v31 = vld [vmem:[%s4754_s1 + $0x5e0] ss:$16 sps:$4 sm:$0xff]  }
  0x96   : > { %2048 = vmatmul.mubr.bf16.gmra.mrb[4].mxu0 %v2792_v34  ;;  %2332 = vmatmul.mubr.bf16.gmra.mrb[4].mxu1 %v2792_v34  ;;  %v3539_v34 = vld [vmem:[%s4754_s1 + $0x60c] ss:$16 sps:$4 sm:$0xff]  }
  0x97   : > { %2081 = vmatpush1.bf16.msra.mxu0 %v3448_v32  ;;  %2365 = vmatpush1.bf16.msra.mxu1 %v3451_v33  ;;  %v3531_v32 = vld [vmem:[%s4754_s1 + $0x5e8] ss:$16 sps:$4 sm:$0xff]   ;;  %v3536_v33 = vld [vmem:[%s4754_s1 + $0x604] ss:$16 sps:$4 sm:$0xff]  }
  0x98   : > { %2082 = vmatprep.subr.bf16.mxu0 %v3456_v37  ;;  %2366 = vmatprep.subr.bf16.mxu1 %v3459_v38  ;;  %v214_v37 = vld [vmem:[%s3911_s10 + $0x70] sm:$0xff] }
  0x99   : > { %2057 = vmatprep.mubr.bf16.mxu0 %v2801_v39  ;;  %2341 = vmatprep.mubr.bf16.mxu1 %v2801_v39  ;;  %v3534_v38 = vld [vmem:[%s4754_s1 + $0x600] ss:$16 sps:$4 sm:$0xff]   ;;  %v3537_v39 = vld [vmem:[%s4754_s1 + $0x608] ss:$16 sps:$4 sm:$0xff]   ;;  %v2794_v47 = vcombine.low %v210_v36, %v214_v37 }
  0x9b   : > { %2083 = vmatpush1.bf16.msra.mxu0 %v3454_v40  ;;  %2367 = vmatpush1.bf16.msra.mxu1 %v3457_v41  ;;  %v3542_v40 = vld [vmem:[%s4754_s1 + $0x624] ss:$16 sps:$4 sm:$0xff]   ;;  %v3545_v41 = vld [vmem:[%s4754_s1 + $0x62c] ss:$16 sps:$4 sm:$0xff]  }
  0x9c   : > { %2084 = vmatprep.subr.bf16.mxu0 %v3462_v42  ;;  %2368 = vmatprep.subr.bf16.mxu1 %v3465_v43  ;;  %v2795_v42 = vcombine.high %v210_v36, %v214_v37  ;;  %v3540_v43 = vld [vmem:[%s4754_s1 + $0x620] ss:$16 sps:$4 sm:$0xff]   ;;  %v3614_v36 = vld [vmem:[%s4754_s1 + $0x7a4] ss:$16 sps:$4 sm:$0xff]   ;;  %v3617_v37 = vld [vmem:[%s4754_s1 + $0x7ac] ss:$16 sps:$4 sm:$0xff]  }
  0x9e   : > { %2058 = vmatmul.mubr.bf16.gmra.mrb[8].mxu0 %v2800_v46  ;;  %2342 = vmatmul.mubr.bf16.gmra.mrb[8].mxu1 %v2800_v46  ;;  %v3551_v46 = vld [vmem:[%s4754_s1 + $0x64c] ss:$16 sps:$4 sm:$0xff]  }
  0x9f   : > { %2085 = vmatpush1.bf16.msra.mxu0 %v3460_v44  ;;  %2369 = vmatpush1.bf16.msra.mxu1 %v3463_v45  ;;  %v3543_v44 = vld [vmem:[%s4754_s1 + $0x628] ss:$16 sps:$4 sm:$0xff]   ;;  %v3548_v45 = vld [vmem:[%s4754_s1 + $0x644] ss:$16 sps:$4 sm:$0xff]  }
  0xa0   : > { %2086 = vmatprep.subr.bf16.mxu0 %v3468_v48  ;;  %2370 = vmatprep.subr.bf16.mxu1 %v3471_v49  ;;  %v218_v48 = vld [vmem:[%s3911_s10 + $0x90] sm:$0xff] }
  0xa1   : > { %2067 = vmatprep.mubr.bf16.mxu0 %v2809_v50  ;;  %2351 = vmatprep.mubr.bf16.mxu1 %v2809_v50  ;;  %v222_v49 = vld [vmem:[%s3911_s10 + $0xb0] sm:$0xff] }
  0xa2   : > { %v3546_v50 = vld [vmem:[%s4754_s1 + $0x640] ss:$16 sps:$4 sm:$0xff]   ;;  %v2802_v59 = vcombine.low %v218_v48, %v222_v49 }
  0xa3   : > { %2087 = vmatpush1.bf16.msra.mxu0 %v3466_v51  ;;  %2371 = vmatpush1.bf16.msra.mxu1 %v3469_v52  ;;  %v3549_v51 = vld [vmem:[%s4754_s1 + $0x648] ss:$16 sps:$4 sm:$0xff]   ;;  %v3554_v52 = vld [vmem:[%s4754_s1 + $0x664] ss:$16 sps:$4 sm:$0xff]  }
  0xa4   : > { %2088 = vmatprep.subr.bf16.mxu0 %v3474_v53  ;;  %2372 = vmatprep.subr.bf16.mxu1 %v3477_v54  ;;  %v3557_v53 = vld [vmem:[%s4754_s1 + $0x66c] ss:$16 sps:$4 sm:$0xff]   ;;  %v2803_v54 = vcombine.high %v218_v48, %v222_v49 }
  0xa5   : > { %v211_v48 = vld [vmem:[%s3911_s10 + $0x58] sm:$0xff] }
  0xa6   : > { %2068 = vmatmul.mubr.bf16.gmra.mrb[12].mxu0 %v2808_v57  ;;  %2352 = vmatmul.mubr.bf16.gmra.mrb[12].mxu1 %v2808_v57  ;;  %v3560_v57 = vld [vmem:[%s4754_s1 + $0x684] ss:$16 sps:$4 sm:$0xff]   ;;  %v215_v49 = vld [vmem:[%s3911_s10 + $0x78] sm:$0xff] }
  0xa7   : > { %2089 = vmatpush1.bf16.msra.mxu0 %v3472_v55  ;;  %2373 = vmatpush1.bf16.msra.mxu1 %v3475_v56  ;;  %v3552_v55 = vld [vmem:[%s4754_s1 + $0x660] ss:$16 sps:$4 sm:$0xff]   ;;  %v3555_v56 = vld [vmem:[%s4754_s1 + $0x668] ss:$16 sps:$4 sm:$0xff]  }
  0xa8   : > { %2090 = vmatprep.subr.bf16.mxu0 %v3480_v60  ;;  %2374 = vmatprep.subr.bf16.mxu1 %v3483_v61  ;;  %v226_v60 = vld [vmem:[%s3911_s10 + $0xd0] sm:$0xff] }
  0xa9   : > { %2108 = vmatprep.mubr.bf16.mxu0 %v2787_v62  ;;  %2392 = vmatprep.mubr.bf16.mxu1 %v2787_v62  ;;  %v3558_v61 = vld [vmem:[%s4754_s1 + $0x680] ss:$16 sps:$4 sm:$0xff]   ;;  %v3561_v62 = vld [vmem:[%s4754_s1 + $0x688] ss:$16 sps:$4 sm:$0xff]  }
  0xab   : > { %2091 = vmatpush1.bf16.msra.mxu0 %v3478_v63  ;;  %2375 = vmatpush1.bf16.msra.mxu1 %v3481_v0  ;;  %v3566_v63 = vld [vmem:[%s4754_s1 + $0x6a4] ss:$16 sps:$4 sm:$0xff]   ;;  %v3569_v0 = vld [vmem:[%s4754_s1 + $0x6ac] ss:$16 sps:$4 sm:$0xff]  }
  0xac   : > { %2092 = vmatprep.subr.bf16.mxu0 %v3486_v1  ;;  %2376 = vmatprep.subr.bf16.mxu1 %v3489_v2  ;;  %v2811_v1 = vcombine.high %v226_v60, %v226_v60  ;;  %v3564_v2 = vld [vmem:[%s4754_s1 + $0x6a0] ss:$16 sps:$4 sm:$0xff]  }
  0xaf   : > { %2093 = vmatpush1.bf16.msra.mxu0 %v3484_v3  ;;  %2377 = vmatpush1.bf16.msra.mxu1 %v3487_v4  ;;  %v3567_v3 = vld [vmem:[%s4754_s1 + $0x6a8] ss:$16 sps:$4 sm:$0xff]   ;;  %v3572_v4 = vld [vmem:[%s4754_s1 + $0x6c4] ss:$16 sps:$4 sm:$0xff]  }
  0xb0   : > { %2094 = vmatprep.subr.bf16.mxu0 %v3492_v5  ;;  %2378 = vmatprep.subr.bf16.mxu1 %v3495_v6  ;;  %v3575_v5 = vld [vmem:[%s4754_s1 + $0x6cc] ss:$16 sps:$4 sm:$0xff]   ;;  %v2810_v6 = vcombine.low %v226_v60, %v226_v60  ;;  %v486_v60 = vlaneseq }
  0xb3   : > { %2095 = vmatpush1.bf16.msra.mxu0 %v3490_v7  ;;  %2379 = vmatpush1.bf16.msra.mxu1 %v3493_v8  ;;  %v4473_v7 = vld [vmem:[%s3911_s10 + $0x18] sm:$0xff] }
  0xb4   : > { %2096 = vmatprep.subr.bf16.mxu0 %v3498_v9  ;;  %2380 = vmatprep.subr.bf16.mxu1 %v3501_v10  ;;  %v4476_v8 = vld [vmem:[%s3911_s10 + $0x38] sm:$0xff]  ;;  %v3570_v9 = vld [vmem:[%s4754_s1 + $0x6c0] ss:$16 sps:$4 sm:$0xff]  }
  0xb5   : > { %v3573_v10 = vld [vmem:[%s4754_s1 + $0x6c8] ss:$16 sps:$4 sm:$0xff]  }
  0xb7   : > { %2097 = vmatpush1.bf16.msra.mxu0 %v3496_v11  ;;  %2381 = vmatpush1.bf16.msra.mxu1 %v3499_v12  ;;  %v3578_v11 = vld [vmem:[%s4754_s1 + $0x6e4] ss:$16 sps:$4 sm:$0xff]   ;;  %v3581_v12 = vld [vmem:[%s4754_s1 + $0x6ec] ss:$16 sps:$4 sm:$0xff]  }
  0xb8   : > { %2098 = vmatprep.subr.bf16.mxu0 %v3504_v13  ;;  %2382 = vmatprep.subr.bf16.mxu1 %v3507_v14  ;;  %v2789_v13 = vcombine.high %v4473_v7, %v4476_v8  ;;  %v3576_v14 = vld [vmem:[%s4754_s1 + $0x6e0] ss:$16 sps:$4 sm:$0xff]  }
  0xbb   : > { %2099 = vmatpush1.bf16.msra.mxu0 %v3502_v15  ;;  %2383 = vmatpush1.bf16.msra.mxu1 %v3505_v16  ;;  %v3579_v15 = vld [vmem:[%s4754_s1 + $0x6e8] ss:$16 sps:$4 sm:$0xff]   ;;  %v3584_v16 = vld [vmem:[%s4754_s1 + $0x704] ss:$16 sps:$4 sm:$0xff]  }
  0xbc   : > { %2100 = vmatprep.subr.bf16.mxu0 %v3510_v17  ;;  %2384 = vmatprep.subr.bf16.mxu1 %v3513_v18  ;;  %v3587_v17 = vld [vmem:[%s4754_s1 + $0x70c] ss:$16 sps:$4 sm:$0xff]   ;;  %v3582_v18 = vld [vmem:[%s4754_s1 + $0x700] ss:$16 sps:$4 sm:$0xff]  }
  0xbf   : > { %2101 = vmatpush1.bf16.msra.mxu0 %v3508_v19  ;;  %2385 = vmatpush1.bf16.msra.mxu1 %v3511_v20  ;;  %v3585_v19 = vld [vmem:[%s4754_s1 + $0x708] ss:$16 sps:$4 sm:$0xff]   ;;  %v3590_v20 = vld [vmem:[%s4754_s1 + $0x724] ss:$16 sps:$4 sm:$0xff]  }
  0xc0   : > { %2102 = vmatprep.subr.bf16.mxu0 %v3516_v21  ;;  %2386 = vmatprep.subr.bf16.mxu1 %v3519_v22  ;;  %v3593_v21 = vld [vmem:[%s4754_s1 + $0x72c] ss:$16 sps:$4 sm:$0xff]   ;;  %v3588_v22 = vld [vmem:[%s4754_s1 + $0x720] ss:$16 sps:$4 sm:$0xff]  }
  0xc3   : > { %2103 = vmatpush1.bf16.msra.mxu0 %v3514_v23  ;;  %2387 = vmatpush1.bf16.msra.mxu1 %v3517_v24  ;;  %v3591_v23 = vld [vmem:[%s4754_s1 + $0x728] ss:$16 sps:$4 sm:$0xff]   ;;  %v3596_v24 = vld [vmem:[%s4754_s1 + $0x744] ss:$16 sps:$4 sm:$0xff]  }
  0xc4   : > { %2104 = vmatprep.subr.bf16.mxu0 %v3523_v25  ;;  %2388 = vmatprep.subr.bf16.mxu1 %v3526_v26  ;;  %v3599_v25 = vld [vmem:[%s4754_s1 + $0x74c] ss:$16 sps:$4 sm:$0xff]   ;;  %v3594_v26 = vld [vmem:[%s4754_s1 + $0x740] ss:$16 sps:$4 sm:$0xff]  }
  0xc7   : > { %2105 = vmatpush1.bf16.msra.mxu0 %v3521_v27  ;;  %2389 = vmatpush1.bf16.msra.mxu1 %v3524_v28  ;;  %v3597_v27 = vld [vmem:[%s4754_s1 + $0x748] ss:$16 sps:$4 sm:$0xff]   ;;  %v3602_v28 = vld [vmem:[%s4754_s1 + $0x764] ss:$16 sps:$4 sm:$0xff]  }
  0xc8   : > { %2106 = vmatprep.subr.bf16.mxu0 %v3530_v29  ;;  %2390 = vmatprep.subr.bf16.mxu1 %v3533_v30  ;;  %v3605_v29 = vld [vmem:[%s4754_s1 + $0x76c] ss:$16 sps:$4 sm:$0xff]   ;;  %v3600_v30 = vld [vmem:[%s4754_s1 + $0x760] ss:$16 sps:$4 sm:$0xff]  }
  0xcb   : > { %2107 = vmatpush1.bf16.msra.mxu0 %v3528_v31  ;;  %2391 = vmatpush1.bf16.msra.mxu1 %v3531_v32  ;;  %v3603_v31 = vld [vmem:[%s4754_s1 + $0x768] ss:$16 sps:$4 sm:$0xff]   ;;  %v3608_v32 = vld [vmem:[%s4754_s1 + $0x784] ss:$16 sps:$4 sm:$0xff]  }
  0xcc   : > { %2147 = vmatprep.subr.bf16.mxu0 %v3536_v33  ;;  %2431 = vmatprep.subr.bf16.mxu1 %v3539_v34  ;;  %v3611_v33 = vld [vmem:[%s4754_s1 + $0x78c] ss:$16 sps:$4 sm:$0xff]   ;;  %v3606_v34 = vld [vmem:[%s4754_s1 + $0x780] ss:$16 sps:$4 sm:$0xff]  }
  0xce   : > { %2109 = vmatmul.mubr.bf16.vlgmr.msra.gmra.mrb[0].mxu0 %v2786_v35  ;;  %2393 = vmatmul.mubr.bf16.vlgmr.msra.gmra.mrb[0].mxu1 %v2786_v35  ;;  %v3609_v35 = vld [vmem:[%s4754_s1 + $0x788] ss:$16 sps:$4 sm:$0xff]  }
  0xcf   : > { %2148 = vmatpush1.bf16.msra.mxu0 %v3534_v38  ;;  %2432 = vmatpush1.bf16.msra.mxu1 %v3537_v39  ;;  %v3612_v38 = vld [vmem:[%s4754_s1 + $0x7a0] ss:$16 sps:$4 sm:$0xff]   ;;  %v3615_v39 = vld [vmem:[%s4754_s1 + $0x7a8] ss:$16 sps:$4 sm:$0xff]  }
  0xd0   : > { %2149 = vmatprep.subr.bf16.mxu0 %v3542_v40  ;;  %2433 = vmatprep.subr.bf16.mxu1 %v3545_v41  ;;  %v3622_v40 = vld [vmem:[%s4754_s1 + $0x7c4] ss:$16 sps:$4 sm:$0xff]   ;;  %v3625_v41 = vld [vmem:[%s4754_s1 + $0x7cc] ss:$16 sps:$4 sm:$0xff]  }
  0xd1   : > { %2118 = vmatprep.mubr.bf16.mxu0 %v2795_v42  ;;  %2402 = vmatprep.mubr.bf16.mxu1 %v2795_v42  ;;  %v3620_v42 = vld [vmem:[%s4754_s1 + $0x7c0] ss:$16 sps:$4 sm:$0xff]  }
  0xd3   : > { %2150 = vmatpush1.bf16.msra.mxu0 %v3540_v43  ;;  %2434 = vmatpush1.bf16.msra.mxu1 %v3543_v44  ;;  %v3623_v43 = vld [vmem:[%s4754_s1 + $0x7c8] ss:$16 sps:$4 sm:$0xff]   ;;  %v3628_v44 = vld [vmem:[%s4754_s1 + $0x7e4] ss:$16 sps:$4 sm:$0xff]  }
  0xd4   : > { %2151 = vmatprep.subr.bf16.mxu0 %v3548_v45  ;;  %2435 = vmatprep.subr.bf16.mxu1 %v3551_v46  ;;  %v3631_v45 = vld [vmem:[%s4754_s1 + $0x7ec] ss:$16 sps:$4 sm:$0xff]   ;;  %v3626_v46 = vld [vmem:[%s4754_s1 + $0x7e0] ss:$16 sps:$4 sm:$0xff]  }
  0xd6   : > { %2119 = vmatmul.mubr.bf16.gmra.mrb[4].mxu0 %v2794_v47  ;;  %2403 = vmatmul.mubr.bf16.gmra.mrb[4].mxu1 %v2794_v47  ;;  %v3629_v47 = vld [vmem:[%s4754_s1 + $0x7e8] ss:$16 sps:$4 sm:$0xff]  }
  0xd7   : > { %2152 = vmatpush1.bf16.msra.mxu0 %v3546_v50  ;;  %2436 = vmatpush1.bf16.msra.mxu1 %v3549_v51  ;;  %v2788_v50 = vcombine.low %v4473_v7, %v4476_v8  ;;  %v2797_v51 = vcombine.high %v211_v48, %v215_v49 }
  0xd8   : > { %2153 = vmatprep.subr.bf16.mxu0 %v3554_v52  ;;  %2437 = vmatprep.subr.bf16.mxu1 %v3557_v53  ;;  %v219_v52 = vld [vmem:[%s3911_s10 + $0x98] sm:$0xff] }
  0xd9   : > { %2128 = vmatprep.mubr.bf16.mxu0 %v2803_v54  ;;  %2412 = vmatprep.mubr.bf16.mxu1 %v2803_v54  ;;  %v223_v53 = vld [vmem:[%s3911_s10 + $0xb8] sm:$0xff]  ;;  %v2796_v54 = vcombine.low %v211_v48, %v215_v49 }
  0xdb   : > { %2154 = vmatpush1.bf16.msra.mxu0 %v3552_v55  ;;  %2438 = vmatpush1.bf16.msra.mxu1 %v3555_v56  ;;  %v2805_v55 = vcombine.high %v219_v52, %v223_v53  ;;  %v227_v56 = vld [vmem:[%s3911_s10 + $0xd8] sm:$0xff] }
  0xdc   : > { %2155 = vmatprep.subr.bf16.mxu0 %v3560_v57  ;;  %2439 = vmatprep.subr.bf16.mxu1 %v3563_v58  ;;  %v2804_v57 = vcombine.low %v219_v52, %v223_v53  ;;  %v2813_v58 = vcombine.high %v227_v56, %v227_v56 }
  0xde   : > { %2129 = vmatmul.mubr.bf16.gmra.mrb[8].mxu0 %v2802_v59  ;;  %2413 = vmatmul.mubr.bf16.gmra.mrb[8].mxu1 %v2802_v59  ;;  %v2812_v59 = vcombine.low %v227_v56, %v227_v56 }
  0xdf   : > { %2156 = vmatpush1.bf16.msra.mxu0 %v3558_v61  ;;  %2440 = vmatpush1.bf16.msra.mxu1 %v3561_v62  ;;  %v487_v61 = vshrl.u32 %v486_v60, 7 }
  0xe0   : > { %2157 = vmatprep.subr.bf16.mxu0 %v3566_v63  ;;  %2441 = vmatprep.subr.bf16.mxu1 %v3569_v0  ;;  %v484_v0 = vld [vmem:[%s4755_s2] ss:$4 sm:$0xf] }
  0xe1   : > { %2138 = vmatprep.mubr.bf16.mxu0 %v2811_v1  ;;  %2422 = vmatprep.mubr.bf16.mxu1 %v2811_v1  ;;  %v488_v62 = vsub.s32 0, %v487_v61  ;;  %v496_v63 = vsub.s32 2, %v487_v61  ;;  %v492_v1 = vsub.s32 1, %v487_v61 }
  0xe3   : > { %2158 = vmatpush1.bf16.msra.mxu0 %v3564_v2  ;;  %2442 = vmatpush1.bf16.msra.mxu1 %v3567_v3  ;;  %v500_v2 = vsub.s32 3, %v487_v61  ;;  %v4604_v3 = vrot.slane %v484_v0, %v488_v62 }
  0xe4   : > { %2159 = vmatprep.subr.bf16.mxu0 %v3572_v4  ;;  %2443 = vmatprep.subr.bf16.mxu1 %v3575_v5  ;;  %v4606_v4 = vrot.slane %v484_v0, %v496_v63  ;;  %v3070_v5 = vld [vmem:[%s4755_s2 + $0x1] ss:$4 sm:$0xf] }
  0xe5   : > { %v4613_v7 = vrot.slane %v484_v0, %v500_v2 }
  0xe6   : > { %2139 = vmatmul.mubr.bf16.gmra.mrb[12].mxu0 %v2810_v6  ;;  %2423 = vmatmul.mubr.bf16.gmra.mrb[12].mxu1 %v2810_v6  ;;  %v4611_v6 = vrot.slane %v484_v0, %v492_v1 }
  0xe7   : > { %2160 = vmatpush1.bf16.msra.mxu0 %v3570_v9  ;;  %2444 = vmatpush1.bf16.msra.mxu1 %v3573_v10 }
  0xe8   : > { %2161 = vmatprep.subr.bf16.mxu0 %v3578_v11  ;;  %2445 = vmatprep.subr.bf16.mxu1 %v3581_v12  ;;  %v4616_v11 = vrot.slane %v3070_v5, %v488_v62 }
  0xe9   : > { %2179 = vmatprep.mubr.bf16.mxu0 %v2789_v13  ;;  %2463 = vmatprep.mubr.bf16.mxu1 %v2789_v13 }
  0xeb   : > { %2162 = vmatpush1.bf16.msra.mxu0 %v3576_v14  ;;  %2446 = vmatpush1.bf16.msra.mxu1 %v3579_v15 }
  0xec   : > { %2163 = vmatprep.subr.bf16.mxu0 %v3584_v16  ;;  %2447 = vmatprep.subr.bf16.mxu1 %v3587_v17  ;;  %v4620_v16 = vrot.slane %v3070_v5, %v492_v1 }
  0xef   : > { %2164 = vmatpush1.bf16.msra.mxu0 %v3582_v18  ;;  %2448 = vmatpush1.bf16.msra.mxu1 %v3585_v19 }
  0xf0   : > { %2165 = vmatprep.subr.bf16.mxu0 %v3590_v20  ;;  %2449 = vmatprep.subr.bf16.mxu1 %v3593_v21 }
  0xf3   : > { %2166 = vmatpush1.bf16.msra.mxu0 %v3588_v22  ;;  %2450 = vmatpush1.bf16.msra.mxu1 %v3591_v23 }
  0xf4   : > { %2167 = vmatprep.subr.bf16.mxu0 %v3596_v24  ;;  %2451 = vmatprep.subr.bf16.mxu1 %v3599_v25  ;;  %v4624_v25 = vrot.slane %v3070_v5, %v496_v63 }
  0xf7   : > { %2168 = vmatpush1.bf16.msra.mxu0 %v3594_v26  ;;  %2452 = vmatpush1.bf16.msra.mxu1 %v3597_v27 }
  0xf8   : > { %2169 = vmatprep.subr.bf16.mxu0 %v3602_v28  ;;  %2453 = vmatprep.subr.bf16.mxu1 %v3605_v29 }
  0xfb   : > { %2170 = vmatpush1.bf16.msra.mxu0 %v3600_v30  ;;  %2454 = vmatpush1.bf16.msra.mxu1 %v3603_v31 }
  0xfc   : > { %2171 = vmatprep.subr.bf16.mxu0 %v3608_v32  ;;  %2455 = vmatprep.subr.bf16.mxu1 %v3611_v33 }
  0xff   : > { %2172 = vmatpush1.bf16.msra.mxu0 %v3606_v34  ;;  %2456 = vmatpush1.bf16.msra.mxu1 %v3609_v35  ;;  %v4631_v35 = vrot.slane %v3070_v5, %v500_v2 }
 0x100   : > { %2173 = vmatprep.subr.bf16.mxu0 %v3614_v36  ;;  %2457 = vmatprep.subr.bf16.mxu1 %v3617_v37 }
 0x103   : > { %2174 = vmatpush1.bf16.msra.mxu0 %v3612_v38  ;;  %2458 = vmatpush1.bf16.msra.mxu1 %v3615_v39 }
 0x104   : > { %2175 = vmatprep.subr.bf16.mxu0 %v3622_v40  ;;  %2459 = vmatprep.subr.bf16.mxu1 %v3625_v41 }
 0x107   : > { %2176 = vmatpush1.bf16.msra.mxu0 %v3620_v42  ;;  %2460 = vmatpush1.bf16.msra.mxu1 %v3623_v43 }
 0x108   : > { %2177 = vmatprep.subr.bf16.mxu0 %v3628_v44  ;;  %2461 = vmatprep.subr.bf16.mxu1 %v3631_v45 }
 0x10b   : > { %2178 = vmatpush1.bf16.msra.mxu0 %v3626_v46  ;;  %2462 = vmatpush1.bf16.msra.mxu1 %v3629_v47 }
 0x10e   : > { %2180 = vmatmul.mubr.bf16.vlgmr.msra.gmra.mrb[0].mxu0 %v2788_v50  ;;  %2464 = vmatmul.mubr.bf16.vlgmr.msra.gmra.mrb[0].mxu1 %v2788_v50 }
 0x10f   : > { %2189 = vmatprep.mubr.bf16.mxu0 %v2797_v51  ;;  %2473 = vmatprep.mubr.bf16.mxu1 %v2797_v51 }
 0x116   : > { %2190 = vmatmul.mubr.bf16.gmra.mrb[4].mxu0 %v2796_v54  ;;  %2474 = vmatmul.mubr.bf16.gmra.mrb[4].mxu1 %v2796_v54 }
 0x117   : > { %2199 = vmatprep.mubr.bf16.mxu0 %v2805_v55  ;;  %2483 = vmatprep.mubr.bf16.mxu1 %v2805_v55 }
 0x11e   : > { %2200 = vmatmul.mubr.bf16.gmra.mrb[8].mxu0 %v2804_v57  ;;  %2484 = vmatmul.mubr.bf16.gmra.mrb[8].mxu1 %v2804_v57 }
 0x11f   : > { %2209 = vmatprep.mubr.bf16.mxu0 %v2813_v58  ;;  %2493 = vmatprep.mubr.bf16.mxu1 %v2813_v58 }
 0x126   : > { %2210 = vmatmul.mubr.bf16.gmra.mrb[12].mxu0 %v2812_v59  ;;  %2494 = vmatmul.mubr.bf16.gmra.mrb[12].mxu1 %v2812_v59 }
 0x1e1   : > { %v2181_v8 = vpop.f32.mrb[0].mxu0  ;;  %v2465_v9 = vpop.f32.mrb[0].mxu1 }
 0x1e2   : > { %v3076_v10 = vadd.f32 %v2181_v8, %v4604_v3  ;;  %v3090_v12 = vadd.f32 %v2465_v9, %v4606_v4  ;;  %v2183_v13 = vpop.f32.mrb[1].mxu0  ;;  %v2467_v14 = vpop.f32.mrb[1].mxu1 }
 0x1e3   : > { %v3077_v15 = vadd.f32 %v2183_v13, %v4611_v6  ;;  %v3091_v17 = vadd.f32 %v2467_v14, %v4613_v7  ;;  %v2185_v18 = vpop.f32.mrb[2].mxu0  ;;  %v2469_v19 = vpop.f32.mrb[2].mxu1 }
 0x1e4   : > { %v2502_v20 = vmax.f32 %v3076_v10, 0.0  ;;  %v3078_v21 = vadd.f32 %v2185_v18, %v4604_v3  ;;  %v2187_v22 = vpop.f32.mrb[3].mxu0  ;;  %v2471_v23 = vpop.f32.mrb[3].mxu1  ;;  %v2504_v24 = vmax.f32 %v3090_v12, 0.0  ;;  %v3092_v30 = vadd.f32 %v2469_v19, %v4606_v4 }
 0x1e5   : > { %v2503_v26 = vmax.f32 %v3077_v15, 0.0  ;;  %v3079_v27 = vadd.f32 %v2187_v22, %v4611_v6  ;;  %v3093_v31 = vadd.f32 %v2471_v23, %v4613_v7  ;;  %v2505_v33 = vmax.f32 %v3091_v17, 0.0 }
 0x1e6   : > { %v2553_v28 = vmul.f32 %v4616_v11, %v2502_v20  ;;  %v2506_v29 = vmax.f32 %v3078_v21, 0.0  ;;  %v2555_v37 = vmul.f32 %v4624_v25, %v2504_v24  ;;  %v2508_v42 = vmax.f32 %v3092_v30, 0.0 }
 0x1e7   : > { %v2554_v32 = vmul.f32 %v4620_v16, %v2503_v26  ;;  %v2507_v34 = vmax.f32 %v3079_v27, 0.0  ;;  %v2509_v43 = vmax.f32 %v3093_v31, 0.0  ;;  %v2556_v52 = vmul.f32 %v4631_v35, %v2505_v33 }
 0x1e8   : > { %v2557_v36 = vmul.f32 %v4616_v11, %v2506_v29  ;;  %v2559_v0 = vmul.f32 %v4624_v25, %v2508_v42 }
 0x1e9   : > { %v2558_v38 = vmul.f32 %v4620_v16, %v2507_v34  ;;  %v2191_v39 = vpop.f32.mrb[4].mxu0  ;;  %v2475_v40 = vpop.f32.mrb[4].mxu1  ;;  %v2581_v41 = vadd.f32 %v2554_v32, %v2553_v28  ;;  %v2560_v12 = vmul.f32 %v4631_v35, %v2509_v43 }
 0x1ea   : > { %v3080_v44 = vadd.f32 %v2191_v39, %v4604_v3  ;;  %v3094_v45 = vadd.f32 %v2475_v40, %v4606_v4  ;;  %v2193_v46 = vpop.f32.mrb[5].mxu0  ;;  %v2477_v47 = vpop.f32.mrb[5].mxu1 }
 0x1eb   : > { %v2586_v48 = vadd.f32 %v2558_v38, %v2557_v36  ;;  %v3081_v49 = vadd.f32 %v2193_v46, %v4611_v6  ;;  %v2195_v50 = vpop.f32.mrb[6].mxu0  ;;  %v2479_v51 = vpop.f32.mrb[6].mxu1  ;;  %v2582_v53 = vadd.f32 %v2581_v41, %v2555_v37  ;;  %v3095_v55 = vadd.f32 %v2477_v47, %v4613_v7 }
 0x1ec   : > { %v2510_v54 = vmax.f32 %v3080_v44, 0.0  ;;  %v3082_v56 = vadd.f32 %v2195_v50, %v4604_v3  ;;  %v3096_v57 = vadd.f32 %v2479_v51, %v4606_v4  ;;  %v2197_v58 = vpop.f32.mrb[7].mxu0  ;;  %v2481_v59 = vpop.f32.mrb[7].mxu1  ;;  %v2512_v60 = vmax.f32 %v3094_v45, 0.0 }
 0x1ed   : > { %v2511_v61 = vmax.f32 %v3081_v49, 0.0  ;;  %v3083_v62 = vadd.f32 %v2197_v58, %v4611_v6  ;;  %v3097_v63 = vadd.f32 %v2481_v59, %v4613_v7  ;;  %v2583_v10 = vadd.f32 %v2582_v53, %v2556_v52 }
 0x1ee   : > { %v2561_v1 = vmul.f32 %v4616_v11, %v2510_v54  ;;  %v2514_v2 = vmax.f32 %v3082_v56, 0.0  ;;  %v2516_v5 = vmax.f32 %v3096_v57, 0.0  ;;  %v2513_v13 = vmax.f32 %v3095_v55, 0.0 }
 0x1ef   : > { %v2562_v8 = vmul.f32 %v4620_v16, %v2511_v61  ;;  %v2515_v9 = vmax.f32 %v3083_v62, 0.0  ;;  %v2587_v15 = vadd.f32 %v2586_v48, %v2559_v0  ;;  %v2563_v17 = vmul.f32 %v4624_v25, %v2512_v60  ;;  %2584 = vadd.xlane.f32.xlu0 %v2583_v10 }
 0x1f0   : > { %v2565_v14 = vmul.f32 %v4616_v11, %v2514_v2  ;;  %v2517_v19 = vmax.f32 %v3097_v63, 0.0  ;;  %v2567_v23 = vmul.f32 %v4624_v25, %v2516_v5  ;;  %v2564_v50 = vmul.f32 %v4631_v35, %v2513_v13 }
 0x1f1   : > { %v2566_v18 = vmul.f32 %v4620_v16, %v2515_v9  ;;  %v2201_v20 = vpop.f32.mrb[8].mxu0  ;;  %v2485_v21 = vpop.f32.mrb[8].mxu1  ;;  %v2591_v22 = vadd.f32 %v2562_v8, %v2561_v1  ;;  %v2588_v29 = vadd.f32 %v2587_v15, %v2560_v12 }
 0x1f2   : > { %v3084_v24 = vadd.f32 %v2201_v20, %v4604_v3  ;;  %v3098_v26 = vadd.f32 %v2485_v21, %v4606_v4  ;;  %v2203_v27 = vpop.f32.mrb[9].mxu0  ;;  %v2487_v28 = vpop.f32.mrb[9].mxu1  ;;  %v2568_v51 = vmul.f32 %v4631_v35, %v2517_v19 }
 0x1f3   : > { %v2596_v30 = vadd.f32 %v2566_v18, %v2565_v14  ;;  %v3085_v31 = vadd.f32 %v2203_v27, %v4611_v6  ;;  %v3099_v32 = vadd.f32 %v2487_v28, %v4613_v7  ;;  %v2205_v33 = vpop.f32.mrb[10].mxu0  ;;  %v2489_v34 = vpop.f32.mrb[10].mxu1  ;;  %v2592_v36 = vadd.f32 %v2591_v22, %v2563_v17  ;;  %2589 = vadd.xlane.f32.xlu0 %v2588_v29 }
 0x1f4   : > { %v2518_v37 = vmax.f32 %v3084_v24, 0.0  ;;  %v2520_v38 = vmax.f32 %v3098_v26, 0.0  ;;  %v3086_v39 = vadd.f32 %v2205_v33, %v4604_v3  ;;  %v3100_v40 = vadd.f32 %v2489_v34, %v4606_v4  ;;  %v2207_v41 = vpop.f32.mrb[11].mxu0  ;;  %v2491_v42 = vpop.f32.mrb[11].mxu1 }
 0x1f5   : > { %v2519_v43 = vmax.f32 %v3085_v31, 0.0  ;;  %v2521_v44 = vmax.f32 %v3099_v32, 0.0  ;;  %v3087_v45 = vadd.f32 %v2207_v41, %v4611_v6  ;;  %v3101_v46 = vadd.f32 %v2491_v42, %v4613_v7 }
 0x1f6   : > { %v2569_v47 = vmul.f32 %v4616_v11, %v2518_v37  ;;  %v2522_v48 = vmax.f32 %v3086_v39, 0.0  ;;  %v2524_v49 = vmax.f32 %v3100_v40, 0.0  ;;  %v2593_v56 = vadd.f32 %v2592_v36, %v2564_v50 }
 0x1f7   : > { %v2570_v52 = vmul.f32 %v4620_v16, %v2519_v43  ;;  %v2523_v53 = vmax.f32 %v3087_v45, 0.0  ;;  %v2525_v55 = vmax.f32 %v3101_v46, 0.0  ;;  %v2597_v57 = vadd.f32 %v2596_v30, %v2567_v23 }
 0x1f8   : > { %v2573_v54 = vmul.f32 %v4616_v11, %v2522_v48  ;;  %v2571_v58 = vmul.f32 %v4624_v25, %v2520_v38  ;;  %v2572_v60 = vmul.f32 %v4631_v35, %v2521_v44  ;;  %v2575_v0 = vmul.f32 %v4624_v25, %v2524_v49  ;;  %2594 = vadd.xlane.f32.xlu1 %v2593_v56  ;;  %v2635_v56 = vld [vmem:[%s4756_s3] sm:$0xff] }
 0x1f9   : > { %v2601_v59 = vadd.f32 %v2570_v52, %v2569_v47  ;;  %v2574_v61 = vmul.f32 %v4620_v16, %v2523_v53  ;;  %v2211_v62 = vpop.f32.mrb[12].mxu0  ;;  %v2495_v63 = vpop.f32.mrb[12].mxu1  ;;  %v2598_v9 = vadd.f32 %v2597_v57, %v2568_v51  ;;  %v2576_v18 = vmul.f32 %v4631_v35, %v2525_v55  ;;  %v2637_v57 = vld [vmem:[%s4756_s3 + $0x10] sm:$0xff] }
 0x1fa   : > { %v3088_v1 = vadd.f32 %v2211_v62, %v4604_v3  ;;  %v3102_v2 = vadd.f32 %v2495_v63, %v4606_v4  ;;  %v2213_v5 = vpop.f32.mrb[13].mxu0  ;;  %v2497_v8 = vpop.f32.mrb[13].mxu1  ;;  %v3700_v29 = vmov 0   ;;  %v2639_v63 = vld [vmem:[%s4756_s3 + $0x20] sm:$0xff] }
 0x1fb   : > { %v2606_v10 = vadd.f32 %v2574_v61, %v2573_v54  ;;  %v3089_v12 = vadd.f32 %v2213_v5, %v4611_v6  ;;  %v3103_v13 = vadd.f32 %v2497_v8, %v4613_v7  ;;  %v2215_v14 = vpop.f32.mrb[14].mxu0  ;;  %v2499_v15 = vpop.f32.mrb[14].mxu1  ;;  %v2602_v17 = vadd.f32 %v2601_v59, %v2571_v58  ;;  %3241 = vset.pattern.permute.xlu0 %v3700_v29  ;;  %v2636_v54 = vld [vmem:[%s4756_s3 + $0x8] sm:$0xff] }
 0x1fc   : > { %v2526_v19 = vmax.f32 %v3088_v1, 0.0  ;;  %v2216_v20 = vpop.f32.mrb[15].mxu0  ;;  %v2500_v21 = vpop.f32.mrb[15].mxu1  ;;  %v2528_v22 = vmax.f32 %v3102_v2, 0.0  ;;  %2599 = vadd.xlane.f32.xlu1 %v2598_v9  ;;  %v2640_v5 = vld [vmem:[%s4756_s3 + $0x28] sm:$0xff]  ;;  %v2641_v14 = vld [vmem:[%s4756_s3 + $0x30] sm:$0xff] }
 0x1fd   : > { %v2527_v3 = vmax.f32 %v3089_v12, 0.0  ;;  %v2603_v23 = vadd.f32 %v2602_v17, %v2572_v60  ;;  %v2607_v4 = vadd.f32 %v2606_v10, %v2575_v0  ;;  %v2529_v6 = vmax.f32 %v3103_v13, 0.0  ;;  %3240 = vset.pattern.permute.xlu1 %v3700_v29  ;;  %v2638_v60 = vld [vmem:[%s4756_s3 + $0x18] sm:$0xff] }
 0x1fe   : > { %v2577_v24 = vmul.f32 %v4616_v11, %v2526_v19  ;;  %v2579_v27 = vmul.f32 %v4624_v25, %v2528_v22  ;;  %v3071_v11 = vld [vmem:[%s4755_s2 + $0x2] ss:$0 sm:$0xff] }
 0x1ff   : > { %v2578_v26 = vmul.f32 %v4620_v16, %v2527_v3  ;;  %2604 = vadd.xlane.f32.xlu0 %v2603_v23  ;;  %v2608_v7 = vadd.f32 %v2607_v4, %v2576_v18  ;;  %v2580_v30 = vmul.f32 %v4631_v35, %v2529_v6 }
 0x201   : > { %v2611_v28 = vadd.f32 %v2578_v26, %v2577_v24  ;;  %2609 = vadd.xlane.f32.xlu1 %v2608_v7  ;;  %v2696_v24 = vld [vmem:[%s4756_s3 + $0x38] sm:$0x1] }
 0x203   : > { %v2612_v31 = vadd.f32 %v2611_v28, %v2579_v27 }
 0x205   : > { %v2613_v32 = vadd.f32 %v2612_v31, %v2580_v30 }
 0x207   : > { %2614 = vadd.xlane.f32.xlu0 %v2613_v32 }
 0x27c   : > { %v2585_v16 = vpop.xlane.xlu0 %2584 }
 0x27d   : > { %v2621_v33 = vadd.f32 %v3071_v11, %v2585_v16 }
 0x27f   : > { %v2628_v34 = vmax.f32 %v2621_v33, 0.0 }
 0x280   : > { %v2590_v36 = vpop.xlane.xlu0 %2589 }
 0x281   : > { %v2622_v37 = vadd.f32 %v3071_v11, %v2590_v36  ;;  %2644 = vperm.xlu1 %3240, %v2628_v34  }
 0x283   : > { %v2629_v25 = vmax.f32 %v2622_v37, 0.0 }
 0x285   : > { %v2595_v38 = vpop.xlane.xlu1 %2594  ;;  %2649 = vperm.xlu0 %3241, %v2629_v25  }
 0x286   : > { %v2623_v39 = vadd.f32 %v3071_v11, %v2595_v38 }
 0x288   : > { %v2630_v40 = vmax.f32 %v2623_v39, 0.0 }
 0x289   : > { %v2600_v35 = vpop.xlane.xlu1 %2599 }
 0x28a   : > { %v2624_v41 = vadd.f32 %v3071_v11, %v2600_v35  ;;  %2654 = vperm.xlu1 %3240, %v2630_v40  }
 0x28c   : > { %v2605_v42 = vpop.xlane.xlu0 %2604  ;;  %v2631_v44 = vmax.f32 %v2624_v41, 0.0 }
 0x28d   : > { %v2625_v43 = vadd.f32 %v3071_v11, %v2605_v42 }
 0x28e   : > { %v2610_v45 = vpop.xlane.xlu1 %2609  ;;  %2659 = vperm.xlu1 %3240, %v2631_v44  }
 0x28f   : > { %v2632_v46 = vmax.f32 %v2625_v43, 0.0  ;;  %v2626_v47 = vadd.f32 %v3071_v11, %v2610_v45 }
 0x291   : > { %v2633_v50 = vmax.f32 %v2626_v47, 0.0 }
 0x292   : > { %2664 = vperm.xlu1 %3240, %v2632_v46  }
 0x294   : > { %v2615_v48 = vpop.xlane.xlu0 %2614 }
 0x295   : > { %v2627_v49 = vadd.f32 %v3071_v11, %v2615_v48 }
 0x296   : > { %2669 = vperm.xlu1 %3240, %v2633_v50  }
 0x297   : > { %v2634_v51 = vmax.f32 %v2627_v49, 0.0 }
 0x29a   : > { %2674 = vperm.xlu1 %3240, %v2634_v51  }
 0x300   : > { %v2645_v52 = vpop.permute.xlu1 %2644 }
 0x301   : > { %v2677_v61 = vmul.f32 %v2645_v52, %v2635_v56 }
 0x304   : > { %v2650_v55 = vpop.permute.xlu0 %2649 }
 0x305   : > { %v2678_v59 = vmul.f32 %v2650_v55, %v2636_v54 }
 0x307   : > { %v2684_v1 = vadd.f32 %v2678_v59, %v2677_v61 }
 0x309   : > { %v2655_v53 = vpop.permute.xlu1 %2654 }
 0x30a   : > { %v2679_v62 = vmul.f32 %v2655_v53, %v2637_v57 }
 0x30c   : > { %v2685_v8 = vadd.f32 %v2684_v1, %v2679_v62 }
 0x30d   : > { %v2660_v58 = vpop.permute.xlu1 %2659 }
 0x30e   : > { %v2680_v2 = vmul.f32 %v2660_v58, %v2638_v60 }
 0x310   : > { %v2686_v12 = vadd.f32 %v2685_v8, %v2680_v2 }
 0x311   : > { %v2665_v0 = vpop.permute.xlu1 %2664 }
 0x312   : > { %v2681_v9 = vmul.f32 %v2665_v0, %v2639_v63 }
 0x314   : > { %v2687_v15 = vadd.f32 %v2686_v12, %v2681_v9 }
 0x315   : > { %v2670_v10 = vpop.permute.xlu1 %2669 }
 0x316   : > { %v2682_v13 = vmul.f32 %v2670_v10, %v2640_v5 }
 0x318   : > { %v2688_v18 = vadd.f32 %v2687_v15, %v2682_v13 }
 0x319   : > { %v2675_v17 = vpop.permute.xlu1 %2674 }
 0x31a   : > { %v2683_v19 = vmul.f32 %v2675_v17, %v2641_v14 }
 0x31c   : > { %v2689_v20 = vadd.f32 %v2688_v18, %v2683_v19 }
 0x31e   : > { %v2690_v21 = vrot.slane %v2689_v20, 4 }
 0x320   : > { %v2691_v22 = vadd.f32 %v2690_v21, %v2689_v20 }
 0x322   : > { %v2692_v3 = vrot.slane %v2691_v22, 2 }
 0x324   : > { %v2693_v23 = vadd.f32 %v2692_v3, %v2691_v22 }
 0x326   : > { %v2694_v4 = vrot.slane %v2693_v23, 1 }
 0x328   : > { %v2695_v26 = vadd.f32 %v2694_v4, %v2693_v23 }
 0x32a   : > { %v2697_v6 = vadd.f32 %v2696_v24, %v2695_v26 }
 0x32c   : > { %v2698_v7 = vmul.f32 %v2697_v6, %v2697_v6 }
 0x32e   : > { %v2700_v27 = vsel %vm2699_vm0, %v2698_v7, 0.0 }
 0x32f   : > { %2701 = vadd.xlane.f32.xlu1 %v2700_v27 }
 0x3bc   : > { %v2702_v28 = vpop.xlane.xlu1 %2701 }
 0x3bd   : > { %3634 = vrsqrt.f32 %v2702_v28  ;;  %vm2703_vm1 = vcmp.gt.f32.partialorder %v2702_v28, 0.0 }
 0x3c7   : > { %v3635_v29 = vpop.eup %3634 }
 0x3c8   : > { %v2705_v30 = vsel %vm2703_vm1, %v3635_v29, 1.0 }
 0x3c9   : > { %v2706_v31 = vmul.f32 %v2705_v30, %v2697_v6 }
 0x3cb   : > { %2707 = vst [vmem:[%s192_s7] sm:$0x1] %v2706_v31 }
 0x3cc   : > { %3649 = shalt.err (!%p3646_p3)
}
 0x3cd   : > { %s3650_s23 = scalar_lea.hbm %s4711_s12, 16  ;;  %s3654_s10 = scalar_lea.hbm %s4757_s4, 32 }
 0x3ce   : > { %p3651_p4 = scmp.ne.s32.totalorder %s4711_s12, %s3650_s23  ;;  %p3655_p9 = scmp.lt.u32.totalorder %s4711_s12, %s4757_s4 }
 0x3cf   : > { %p3656_p10 = scmp.lt.u32.totalorder %s3654_s10, %s3650_s23  ;;  %p3658_p12 = scmp.lt.u32.totalorder %s3650_s23, %s4711_s12 }
 0x3d0   : > { %p3652_p7 = pnand %p3651_p4, %p3765_p5 }
 0x3d1   : > { %p3657_p11 = por %p3656_p10, %p3655_p9 }
 0x3d2   : > { %p3653_p8 = pneg %p3652_p7 }
 0x3d3   : > { %p3659_p13 = por %p3658_p12, %p3657_p11 }
 0x3d5   : > { %p3660_p0 = pnand %p3659_p13, %p3653_p8 }
 0x3d7   : > { %3663 = shalt.err (!%p3660_p0)
}
 0x3d8   : > { %3200 = dma.vmem_to_hbm [thread:$0]  (%p3765_p5), %s4713_s9, 16, %s4711_s12, %s2709_s13  }
 0x3d9 PF: > { %p3206_p1 = scmp.ge.s32.totalorder %s3698_s18, 2  ;;  %s2733_s5 = sand.u32 1, %s3686_s15  }
 0x3da   : > { %s2734_s6 = scalar_lea.sflag [#allocation3], %s2733_s5 }
 0x3db   : > { %p3203_p2 = pnand %p3206_p1, %p3769_p6 }
 0x3dd   : > { %3681 = dma.done.wait (!%p3203_p2), %s2734_s6, 16  }
 0x3de   : > { %3683 = vsyncadd (!%p3203_p2), %s2734_s6, 4294967280  ;;  %p14_p3 = scmp.ge.s32.totalorder %s3752_s21, 4   ;;  %s4760_s15 = smov %s3690_s16 }
 0x3df   : > { %s4761_s16 = smov %s3694_s17  ;;  %s4762_s17 = smov %s3763_s24 }
 0x3e0   : > { %s4763_s18 = smov %s3752_s21  ;;  %16 = sbr.rel (!%p14_p3) target bundleno = 3 (0x3), region = 72 }
 0x3e7   :  { %2738 = vsyncpa [#allocation3], 1 }
 0x3e8   :  { %2740 = vsyncpa [#allocation3 + $0x1], 1 }

</bundles_post_ra>
